<compile_context>
chip_gen: v5e
topology: v5e:2x2
jax: 0.10.0
libtpu: 0.0.40
codegen_flags: <defaults>
</compile_context>

<pallas_src>
import jax
import jax.numpy as jnp
from jax.experimental import pallas as pl
from jax.experimental.pallas import tpu as pltpu

HIDDEN = 50   # nn.LSTM(hidden_size=50)
GP = 128      # per-gate lane padding  (each gate: 50 -> 128 lanes)
HP = 128      # hidden-state lane padding (50 -> 128 lanes)


def _lstm_recurrence_kernel(x_ref, wih_ref, b_ref, whh_ref, h_out_ref):
    """Whole-sequence LSTM recurrence in one invocation (all VMEM-resident).

    x_ref     : (T, BP, 1)   raw inputs (input_size == 1), time-major, batch-padded
    wih_ref   : (1, 4*GP)    W_ih (single input column), gate-padded to 128 lanes/gate
    b_ref     : (1, 4*GP)    b_ih + b_hh, gate-padded
    whh_ref   : (HP, 4*GP)   W_hh^T, zero-padded to 128-lane-aligned gate blocks
    h_out_ref : (T, BP, HP)  hidden state per timestep (lane-dense output slab)

    Padding invariant: pad columns of wih/b/whh are zero, so pad-lane gate
    pre-activations are 0 -> i=f=o=0.5, g=0 -> padded h/c lanes stay exactly 0.
    """
    T = x_ref.shape[0]
    BP = x_ref.shape[1]

    wih = wih_ref[...]                               # (1, 4*GP) resident (hoisted)
    b = b_ref[...]                                   # (1, 4*GP)
    whh = whh_ref[...]                               # (HP, 4*GP)

    h = jnp.zeros((BP, HP), jnp.float32)             # 1 vreg
    c = jnp.zeros((BP, HP), jnp.float32)             # 1 vreg

    # T is small and static: fully unrolled so the LLO scheduler sees the whole
    # recurrence; only h @ W_hh^T sits on the sequential critical path (MXU),
    # the x-projection is a 4-vreg VPU broadcast multiply per step.
    for t in range(T):
        x_t = x_ref[t]                               # (BP, 1)
        gates = (x_t * wih + b
                 + jnp.dot(h, whh, preferred_element_type=jnp.float32))
        # PyTorch gate order i, f, g, o; slices are 128-lane aligned (free views).
        i_g = jax.nn.sigmoid(gates[:, 0 * GP:1 * GP])
        f_g = jax.nn.sigmoid(gates[:, 1 * GP:2 * GP])
        g_g = jnp.tanh(gates[:, 2 * GP:3 * GP])
        o_g = jax.nn.sigmoid(gates[:, 3 * GP:4 * GP])
        c = f_g * c + i_g * g_g
        h = o_g * jnp.tanh(c)
        h_out_ref[t] = h                             # (BP, 128) unmasked store


@jax.jit
def air_model_forward(x, params):
    """x: (B, T, 1) float32 (batch_first, like PyTorch).  Returns (B, T, 1)."""
    B, T, _ = x.shape
    H = HIDDEN
    BP = ((B + 7) // 8) * 8                          # sublane-multiple batch

    # ---- pad parameters into 128-lane-aligned gate blocks (tiny, one-shot) ----
    w_ih = params["w_ih"][:, 0]                      # (4H,)  rows ordered i,f,g,o
    bias = params["b_ih"] + params["b_hh"]           # (4H,)
    wih_pad = (jnp.zeros((4, GP), jnp.float32)
               .at[:, :H].set(w_ih.reshape(4, H)).reshape(1, 4 * GP))
    b_pad = (jnp.zeros((4, GP), jnp.float32)
             .at[:, :H].set(bias.reshape(4, H)).reshape(1, 4 * GP))

    # W_hh^T padded so gate g occupies columns [g*128, g*128+50), rows [0, 50).
    whh_t = params["w_hh"].T                         # (H, 4H)
    whh_pad = (jnp.zeros((HP, 4, GP), jnp.float32)
               .at[:H, :, :H].set(whh_t.reshape(H, 4, H))
               .reshape(HP, 4 * GP))

    # time-major, batch padded raw inputs (only ~T*BP floats cross HBM).
    x_tm = jnp.transpose(x, (1, 0, 2))               # (T, B, 1)
    x_tm = jnp.pad(x_tm, ((0, 0), (0, BP - B), (0, 0)))

    hs = pl.pallas_call(
        _lstm_recurrence_kernel,
        out_shape=jax.ShapeDtypeStruct((T, BP, HP), jnp.float32),
        in_specs=[
            pl.BlockSpec(memory_space=pltpu.MemorySpace.VMEM),   # x (whole array)
            pl.BlockSpec(memory_space=pltpu.MemorySpace.VMEM),   # W_ih padded
            pl.BlockSpec(memory_space=pltpu.MemorySpace.VMEM),   # bias padded
            pl.BlockSpec(memory_space=pltpu.MemorySpace.VMEM),   # W_hh^T padded
        ],
        out_specs=pl.BlockSpec(memory_space=pltpu.MemorySpace.VMEM),
    )(x_tm, wih_pad, b_pad, whh_pad)                 # (T, BP, HP)

    # Linear(50 -> 1), hoisted out of the recurrence (one tiny XLA matmul).
    y_tm = hs[:, :B, :H] @ params["w_out"].T + params["b_out"]   # (T, B, 1)
    return jnp.transpose(y_tm, (1, 0, 2))            # back to (B, T, 1)


def _reference_forward(x, params):
    """Pure-JAX reference (lax.scan) matching torch.nn.LSTM + Linear."""
    H = HIDDEN
    wih_t = params["w_ih"].T
    whh_t = params["w_hh"].T
    b = params["b_ih"] + params["b_hh"]

    def cell(carry, x_t):
        h, c = carry
        gates = x_t @ wih_t + h @ whh_t + b
        i = jax.nn.sigmoid(gates[:, 0:H])
        f = jax.nn.sigmoid(gates[:, H:2 * H])
        g = jnp.tanh(gates[:, 2 * H:3 * H])
        o = jax.nn.sigmoid(gates[:, 3 * H:4 * H])
        c = f * c + i * g
        h = o * jnp.tanh(c)
        return (h, c), h

    B = x.shape[0]
    x_tm = jnp.transpose(x, (1, 0, 2))
    init = (jnp.zeros((B, H), jnp.float32), jnp.zeros((B, H), jnp.float32))
    _, hs = jax.lax.scan(cell, init, x_tm)                 # (T, B, H)
    y = hs @ params["w_out"].T + params["b_out"]           # (T, B, 1)
    return jnp.transpose(y, (1, 0, 2))


def init_params(key):
    """Deterministic init with PyTorch's default U(-1/sqrt(H), 1/sqrt(H))."""
    H = HIDDEN
    k = 1.0 / jnp.sqrt(jnp.float32(H))
    keys = jax.random.split(key, 6)
    u = lambda kk, shape: jax.random.uniform(kk, shape, jnp.float32, -k, k)
    return {
        "w_ih": u(keys[0], (4 * H, 1)),    # LSTM weight_ih_l0
        "w_hh": u(keys[1], (4 * H, H)),    # LSTM weight_hh_l0
        "b_ih": u(keys[2], (4 * H,)),      # LSTM bias_ih_l0
        "b_hh": u(keys[3], (4 * H,)),      # LSTM bias_hh_l0
        "w_out": u(keys[4], (1, H)),       # Linear weight
        "b_out": u(keys[5], (1,)),         # Linear bias
    }


if __name__ == "__main__":
    key = jax.random.PRNGKey(0)
    k_param, k_x = jax.random.split(key)

    B, T = 2, 8
    params = init_params(k_param)
    x = jax.random.normal(k_x, (B, T, 1), dtype=jnp.float32)

    y = jax.block_until_ready(air_model_forward(x, params))

    y_ref = _reference_forward(x, params)
    assert y.shape == (B, T, 1)
    assert jnp.allclose(y, y_ref, atol=1e-4, rtol=1e-4), "mismatch vs reference"

    print("KERNEL_OK")
</pallas_src>

<mosaic_0001>
module attributes {stable_mosaic.version = 11 : i64} {
  func.func @_lstm_recurrence_kernel(%arg0: memref<8x8x1xf32, #tpu.memory_space<vmem>>, %arg1: memref<1x512xf32, #tpu.memory_space<vmem>>, %arg2: memref<1x512xf32, #tpu.memory_space<vmem>>, %arg3: memref<128x512xf32, #tpu.memory_space<vmem>>, %arg4: memref<8x8x128xf32, #tpu.memory_space<vmem>>) attributes {dimension_semantics = [], scalar_prefetch = 0 : i64, scratch_operands = 0 : i64, tpu.core_type = #tpu.core_type<tc>} {
    %c0 = arith.constant 0 : index
    %c0_0 = arith.constant 0 : index
    %0 = vector.load %arg1[%c0, %c0_0] : memref<1x512xf32, #tpu.memory_space<vmem>>, vector<1x512xf32>
    %c0_1 = arith.constant 0 : index
    %c0_2 = arith.constant 0 : index
    %1 = vector.load %arg2[%c0_1, %c0_2] : memref<1x512xf32, #tpu.memory_space<vmem>>, vector<1x512xf32>
    %c0_3 = arith.constant 0 : index
    %c0_4 = arith.constant 0 : index
    %2 = vector.load %arg3[%c0_3, %c0_4] : memref<128x512xf32, #tpu.memory_space<vmem>>, vector<128x512xf32>
    %cst = arith.constant 0.000000e+00 : f32
    %3 = vector.broadcast %cst : f32 to vector<8x128xf32>
    %cst_5 = arith.constant 0.000000e+00 : f32
    %4 = vector.broadcast %cst_5 : f32 to vector<8x128xf32>
    %c0_6 = arith.constant 0 : index
    %c0_7 = arith.constant 0 : index
    %c0_8 = arith.constant 0 : index
    %5 = vector.load %arg0[%c0_6, %c0_7, %c0_8] : memref<8x8x1xf32, #tpu.memory_space<vmem>>, vector<1x8x1xf32>
    %6 = vector.shape_cast %5 : vector<1x8x1xf32> to vector<8x1xf32>
    %7 = vector.broadcast %6 : vector<8x1xf32> to vector<8x512xf32>
    %8 = vector.broadcast %0 : vector<1x512xf32> to vector<8x512xf32>
    %9 = arith.mulf %7, %8 : vector<8x512xf32>
    %10 = vector.broadcast %1 : vector<1x512xf32> to vector<8x512xf32>
    %11 = arith.addf %9, %10 : vector<8x512xf32>
    %cst_9 = arith.constant dense<0.000000e+00> : vector<8x512xf32>
    %12 = tpu.matmul %3, %2, %cst_9 {dimension_numbers = #tpu.dot_dimension_numbers<[1], [0], [0], [1], [0, 0, 1, 1], [], []>} : vector<8x128xf32>, vector<128x512xf32>, vector<8x512xf32> -> vector<8x512xf32>
    %13 = arith.addf %11, %12 : vector<8x512xf32>
    %14 = vector.extract_strided_slice %13 {offsets = [0, 0], sizes = [8, 128], strides = [1, 1]} : vector<8x512xf32> to vector<8x128xf32>
    %15 = arith.negf %14 : vector<8x128xf32>
    %16 = math.exp %15 : vector<8x128xf32>
    %cst_10 = arith.constant 1.000000e+00 : f32
    %17 = vector.broadcast %cst_10 : f32 to vector<8x128xf32>
    %18 = arith.addf %17, %16 : vector<8x128xf32>
    %19 = arith.divf %17, %18 : vector<8x128xf32>
    %20 = vector.extract_strided_slice %13 {offsets = [0, 128], sizes = [8, 128], strides = [1, 1]} : vector<8x512xf32> to vector<8x128xf32>
    %21 = arith.negf %20 : vector<8x128xf32>
    %22 = math.exp %21 : vector<8x128xf32>
    %cst_11 = arith.constant 1.000000e+00 : f32
    %23 = vector.broadcast %cst_11 : f32 to vector<8x128xf32>
    %24 = arith.addf %23, %22 : vector<8x128xf32>
    %25 = arith.divf %23, %24 : vector<8x128xf32>
    %26 = vector.extract_strided_slice %13 {offsets = [0, 256], sizes = [8, 128], strides = [1, 1]} : vector<8x512xf32> to vector<8x128xf32>
    %27 = math.tanh %26 : vector<8x128xf32>
    %28 = vector.extract_strided_slice %13 {offsets = [0, 384], sizes = [8, 128], strides = [1, 1]} : vector<8x512xf32> to vector<8x128xf32>
    %29 = arith.negf %28 : vector<8x128xf32>
    %30 = math.exp %29 : vector<8x128xf32>
    %cst_12 = arith.constant 1.000000e+00 : f32
    %31 = vector.broadcast %cst_12 : f32 to vector<8x128xf32>
    %32 = arith.addf %31, %30 : vector<8x128xf32>
    %33 = arith.divf %31, %32 : vector<8x128xf32>
    %34 = arith.mulf %25, %4 : vector<8x128xf32>
    %35 = arith.mulf %19, %27 : vector<8x128xf32>
    %36 = arith.addf %34, %35 : vector<8x128xf32>
    %37 = math.tanh %36 : vector<8x128xf32>
    %38 = arith.mulf %33, %37 : vector<8x128xf32>
    %c0_13 = arith.constant 0 : index
    %c0_14 = arith.constant 0 : index
    %c0_15 = arith.constant 0 : index
    %39 = vector.load %arg4[%c0_13, %c0_14, %c0_15] : memref<8x8x128xf32, #tpu.memory_space<vmem>>, vector<1x8x128xf32>
    %40 = vector.shape_cast %39 : vector<1x8x128xf32> to vector<8x128xf32>
    %41 = vector.shape_cast %38 : vector<8x128xf32> to vector<1x8x128xf32>
    tpu.vector_store %arg4[%c0_13, %c0_14, %c0_15], %41 {strides = array<i32>} : memref<8x8x128xf32, #tpu.memory_space<vmem>>, vector<1x8x128xf32>,
    %c1 = arith.constant 1 : index
    %c0_16 = arith.constant 0 : index
    %c0_17 = arith.constant 0 : index
    %42 = vector.load %arg0[%c1, %c0_16, %c0_17] : memref<8x8x1xf32, #tpu.memory_space<vmem>>, vector<1x8x1xf32>
    %43 = vector.shape_cast %42 : vector<1x8x1xf32> to vector<8x1xf32>
    %44 = vector.broadcast %43 : vector<8x1xf32> to vector<8x512xf32>
    %45 = vector.broadcast %0 : vector<1x512xf32> to vector<8x512xf32>
    %46 = arith.mulf %44, %45 : vector<8x512xf32>
    %47 = vector.broadcast %1 : vector<1x512xf32> to vector<8x512xf32>
    %48 = arith.addf %46, %47 : vector<8x512xf32>
    %cst_18 = arith.constant dense<0.000000e+00> : vector<8x512xf32>
    %49 = tpu.matmul %38, %2, %cst_18 {dimension_numbers = #tpu.dot_dimension_numbers<[1], [0], [0], [1], [0, 0, 1, 1], [], []>} : vector<8x128xf32>, vector<128x512xf32>, vector<8x512xf32> -> vector<8x512xf32>
    %50 = arith.addf %48, %49 : vector<8x512xf32>
    %51 = vector.extract_strided_slice %50 {offsets = [0, 0], sizes = [8, 128], strides = [1, 1]} : vector<8x512xf32> to vector<8x128xf32>
    %52 = arith.negf %51 : vector<8x128xf32>
    %53 = math.exp %52 : vector<8x128xf32>
    %cst_19 = arith.constant 1.000000e+00 : f32
    %54 = vector.broadcast %cst_19 : f32 to vector<8x128xf32>
    %55 = arith.addf %54, %53 : vector<8x128xf32>
    %56 = arith.divf %54, %55 : vector<8x128xf32>
    %57 = vector.extract_strided_slice %50 {offsets = [0, 128], sizes = [8, 128], strides = [1, 1]} : vector<8x512xf32> to vector<8x128xf32>
    %58 = arith.negf %57 : vector<8x128xf32>
    %59 = math.exp %58 : vector<8x128xf32>
    %cst_20 = arith.constant 1.000000e+00 : f32
    %60 = vector.broadcast %cst_20 : f32 to vector<8x128xf32>
    %61 = arith.addf %60, %59 : vector<8x128xf32>
    %62 = arith.divf %60, %61 : vector<8x128xf32>
    %63 = vector.extract_strided_slice %50 {offsets = [0, 256], sizes = [8, 128], strides = [1, 1]} : vector<8x512xf32> to vector<8x128xf32>
    %64 = math.tanh %63 : vector<8x128xf32>
    %65 = vector.extract_strided_slice %50 {offsets = [0, 384], sizes = [8, 128], strides = [1, 1]} : vector<8x512xf32> to vector<8x128xf32>
    %66 = arith.negf %65 : vector<8x128xf32>
    %67 = math.exp %66 : vector<8x128xf32>
    %cst_21 = arith.constant 1.000000e+00 : f32
    %68 = vector.broadcast %cst_21 : f32 to vector<8x128xf32>
    %69 = arith.addf %68, %67 : vector<8x128xf32>
    %70 = arith.divf %68, %69 : vector<8x128xf32>
    %71 = arith.mulf %62, %36 : vector<8x128xf32>
    %72 = arith.mulf %56, %64 : vector<8x128xf32>
    %73 = arith.addf %71, %72 : vector<8x128xf32>
    %74 = math.tanh %73 : vector<8x128xf32>
    %75 = arith.mulf %70, %74 : vector<8x128xf32>
    %c1_22 = arith.constant 1 : index
    %c0_23 = arith.constant 0 : index
    %c0_24 = arith.constant 0 : index
    %76 = vector.load %arg4[%c1_22, %c0_23, %c0_24] : memref<8x8x128xf32, #tpu.memory_space<vmem>>, vector<1x8x128xf32>
    %77 = vector.shape_cast %76 : vector<1x8x128xf32> to vector<8x128xf32>
    %78 = vector.shape_cast %75 : vector<8x128xf32> to vector<1x8x128xf32>
    tpu.vector_store %arg4[%c1_22, %c0_23, %c0_24], %78 {strides = array<i32>} : memref<8x8x128xf32, #tpu.memory_space<vmem>>, vector<1x8x128xf32>,
    %c2 = arith.constant 2 : index
    %c0_25 = arith.constant 0 : index
    %c0_26 = arith.constant 0 : index
    %79 = vector.load %arg0[%c2, %c0_25, %c0_26] : memref<8x8x1xf32, #tpu.memory_space<vmem>>, vector<1x8x1xf32>
    %80 = vector.shape_cast %79 : vector<1x8x1xf32> to vector<8x1xf32>
    %81 = vector.broadcast %80 : vector<8x1xf32> to vector<8x512xf32>
    %82 = vector.broadcast %0 : vector<1x512xf32> to vector<8x512xf32>
    %83 = arith.mulf %81, %82 : vector<8x512xf32>
    %84 = vector.broadcast %1 : vector<1x512xf32> to vector<8x512xf32>
    %85 = arith.addf %83, %84 : vector<8x512xf32>
    %cst_27 = arith.constant dense<0.000000e+00> : vector<8x512xf32>
    %86 = tpu.matmul %75, %2, %cst_27 {dimension_numbers = #tpu.dot_dimension_numbers<[1], [0], [0], [1], [0, 0, 1, 1], [], []>} : vector<8x128xf32>, vector<128x512xf32>, vector<8x512xf32> -> vector<8x512xf32>
    %87 = arith.addf %85, %86 : vector<8x512xf32>
    %88 = vector.extract_strided_slice %87 {offsets = [0, 0], sizes = [8, 128], strides = [1, 1]} : vector<8x512xf32> to vector<8x128xf32>
    %89 = arith.negf %88 : vector<8x128xf32>
    %90 = math.exp %89 : vector<8x128xf32>
    %cst_28 = arith.constant 1.000000e+00 : f32
    %91 = vector.broadcast %cst_28 : f32 to vector<8x128xf32>
    %92 = arith.addf %91, %90 : vector<8x128xf32>
    %93 = arith.divf %91, %92 : vector<8x128xf32>
    %94 = vector.extract_strided_slice %87 {offsets = [0, 128], sizes = [8, 128], strides = [1, 1]} : vector<8x512xf32> to vector<8x128xf32>
    %95 = arith.negf %94 : vector<8x128xf32>
    %96 = math.exp %95 : vector<8x128xf32>
    %cst_29 = arith.constant 1.000000e+00 : f32
    %97 = vector.broadcast %cst_29 : f32 to vector<8x128xf32>
    %98 = arith.addf %97, %96 : vector<8x128xf32>
    %99 = arith.divf %97, %98 : vector<8x128xf32>
    %100 = vector.extract_strided_slice %87 {offsets = [0, 256], sizes = [8, 128], strides = [1, 1]} : vector<8x512xf32> to vector<8x128xf32>
    %101 = math.tanh %100 : vector<8x128xf32>
    %102 = vector.extract_strided_slice %87 {offsets = [0, 384], sizes = [8, 128], strides = [1, 1]} : vector<8x512xf32> to vector<8x128xf32>
    %103 = arith.negf %102 : vector<8x128xf32>
    %104 = math.exp %103 : vector<8x128xf32>
    %cst_30 = arith.constant 1.000000e+00 : f32
    %105 = vector.broadcast %cst_30 : f32 to vector<8x128xf32>
    %106 = arith.addf %105, %104 : vector<8x128xf32>
    %107 = arith.divf %105, %106 : vector<8x128xf32>
    %108 = arith.mulf %99, %73 : vector<8x128xf32>
    %109 = arith.mulf %93, %101 : vector<8x128xf32>
    %110 = arith.addf %108, %109 : vector<8x128xf32>
    %111 = math.tanh %110 : vector<8x128xf32>
    %112 = arith.mulf %107, %111 : vector<8x128xf32>
    %c2_31 = arith.constant 2 : index
    %c0_32 = arith.constant 0 : index
    %c0_33 = arith.constant 0 : index
    %113 = vector.load %arg4[%c2_31, %c0_32, %c0_33] : memref<8x8x128xf32, #tpu.memory_space<vmem>>, vector<1x8x128xf32>
    %114 = vector.shape_cast %113 : vector<1x8x128xf32> to vector<8x128xf32>
    %115 = vector.shape_cast %112 : vector<8x128xf32> to vector<1x8x128xf32>
    tpu.vector_store %arg4[%c2_31, %c0_32, %c0_33], %115 {strides = array<i32>} : memref<8x8x128xf32, #tpu.memory_space<vmem>>, vector<1x8x128xf32>,
    %c3 = arith.constant 3 : index
    %c0_34 = arith.constant 0 : index
    %c0_35 = arith.constant 0 : index
    %116 = vector.load %arg0[%c3, %c0_34, %c0_35] : memref<8x8x1xf32, #tpu.memory_space<vmem>>, vector<1x8x1xf32>
    %117 = vector.shape_cast %116 : vector<1x8x1xf32> to vector<8x1xf32>
    %118 = vector.broadcast %117 : vector<8x1xf32> to vector<8x512xf32>
    %119 = vector.broadcast %0 : vector<1x512xf32> to vector<8x512xf32>
    %120 = arith.mulf %118, %119 : vector<8x512xf32>
    %121 = vector.broadcast %1 : vector<1x512xf32> to vector<8x512xf32>
    %122 = arith.addf %120, %121 : vector<8x512xf32>
    %cst_36 = arith.constant dense<0.000000e+00> : vector<8x512xf32>
    %123 = tpu.matmul %112, %2, %cst_36 {dimension_numbers = #tpu.dot_dimension_numbers<[1], [0], [0], [1], [0, 0, 1, 1], [], []>} : vector<8x128xf32>, vector<128x512xf32>, vector<8x512xf32> -> vector<8x512xf32>
    %124 = arith.addf %122, %123 : vector<8x512xf32>
    %125 = vector.extract_strided_slice %124 {offsets = [0, 0], sizes = [8, 128], strides = [1, 1]} : vector<8x512xf32> to vector<8x128xf32>
    %126 = arith.negf %125 : vector<8x128xf32>
    %127 = math.exp %126 : vector<8x128xf32>
    %cst_37 = arith.constant 1.000000e+00 : f32
    %128 = vector.broadcast %cst_37 : f32 to vector<8x128xf32>
    %129 = arith.addf %128, %127 : vector<8x128xf32>
    %130 = arith.divf %128, %129 : vector<8x128xf32>
    %131 = vector.extract_strided_slice %124 {offsets = [0, 128], sizes = [8, 128], strides = [1, 1]} : vector<8x512xf32> to vector<8x128xf32>
    %132 = arith.negf %131 : vector<8x128xf32>
    %133 = math.exp %132 : vector<8x128xf32>
    %cst_38 = arith.constant 1.000000e+00 : f32
    %134 = vector.broadcast %cst_38 : f32 to vector<8x128xf32>
    %135 = arith.addf %134, %133 : vector<8x128xf32>
    %136 = arith.divf %134, %135 : vector<8x128xf32>
    %137 = vector.extract_strided_slice %124 {offsets = [0, 256], sizes = [8, 128], strides = [1, 1]} : vector<8x512xf32> to vector<8x128xf32>
    %138 = math.tanh %137 : vector<8x128xf32>
    %139 = vector.extract_strided_slice %124 {offsets = [0, 384], sizes = [8, 128], strides = [1, 1]} : vector<8x512xf32> to vector<8x128xf32>
    %140 = arith.negf %139 : vector<8x128xf32>
    %141 = math.exp %140 : vector<8x128xf32>
    %cst_39 = arith.constant 1.000000e+00 : f32
    %142 = vector.broadcast %cst_39 : f32 to vector<8x128xf32>
    %143 = arith.addf %142, %141 : vector<8x128xf32>
    %144 = arith.divf %142, %143 : vector<8x128xf32>
    %145 = arith.mulf %136, %110 : vector<8x128xf32>
    %146 = arith.mulf %130, %138 : vector<8x128xf32>
    %147 = arith.addf %145, %146 : vector<8x128xf32>
    %148 = math.tanh %147 : vector<8x128xf32>
    %149 = arith.mulf %144, %148 : vector<8x128xf32>
    %c3_40 = arith.constant 3 : index
    %c0_41 = arith.constant 0 : index
    %c0_42 = arith.constant 0 : index
    %150 = vector.load %arg4[%c3_40, %c0_41, %c0_42] : memref<8x8x128xf32, #tpu.memory_space<vmem>>, vector<1x8x128xf32>
    %151 = vector.shape_cast %150 : vector<1x8x128xf32> to vector<8x128xf32>
    %152 = vector.shape_cast %149 : vector<8x128xf32> to vector<1x8x128xf32>
    tpu.vector_store %arg4[%c3_40, %c0_41, %c0_42], %152 {strides = array<i32>} : memref<8x8x128xf32, #tpu.memory_space<vmem>>, vector<1x8x128xf32>,
    %c4 = arith.constant 4 : index
    %c0_43 = arith.constant 0 : index
    %c0_44 = arith.constant 0 : index
    %153 = vector.load %arg0[%c4, %c0_43, %c0_44] : memref<8x8x1xf32, #tpu.memory_space<vmem>>, vector<1x8x1xf32>
    %154 = vector.shape_cast %153 : vector<1x8x1xf32> to vector<8x1xf32>
    %155 = vector.broadcast %154 : vector<8x1xf32> to vector<8x512xf32>
    %156 = vector.broadcast %0 : vector<1x512xf32> to vector<8x512xf32>
    %157 = arith.mulf %155, %156 : vector<8x512xf32>
    %158 = vector.broadcast %1 : vector<1x512xf32> to vector<8x512xf32>
    %159 = arith.addf %157, %158 : vector<8x512xf32>
    %cst_45 = arith.constant dense<0.000000e+00> : vector<8x512xf32>
    %160 = tpu.matmul %149, %2, %cst_45 {dimension_numbers = #tpu.dot_dimension_numbers<[1], [0], [0], [1], [0, 0, 1, 1], [], []>} : vector<8x128xf32>, vector<128x512xf32>, vector<8x512xf32> -> vector<8x512xf32>
    %161 = arith.addf %159, %160 : vector<8x512xf32>
    %162 = vector.extract_strided_slice %161 {offsets = [0, 0], sizes = [8, 128], strides = [1, 1]} : vector<8x512xf32> to vector<8x128xf32>
    %163 = arith.negf %162 : vector<8x128xf32>
    %164 = math.exp %163 : vector<8x128xf32>
    %cst_46 = arith.constant 1.000000e+00 : f32
    %165 = vector.broadcast %cst_46 : f32 to vector<8x128xf32>
    %166 = arith.addf %165, %164 : vector<8x128xf32>
    %167 = arith.divf %165, %166 : vector<8x128xf32>
    %168 = vector.extract_strided_slice %161 {offsets = [0, 128], sizes = [8, 128], strides = [1, 1]} : vector<8x512xf32> to vector<8x128xf32>
    %169 = arith.negf %168 : vector<8x128xf32>
    %170 = math.exp %169 : vector<8x128xf32>
    %cst_47 = arith.constant 1.000000e+00 : f32
    %171 = vector.broadcast %cst_47 : f32 to vector<8x128xf32>
    %172 = arith.addf %171, %170 : vector<8x128xf32>
    %173 = arith.divf %171, %172 : vector<8x128xf32>
    %174 = vector.extract_strided_slice %161 {offsets = [0, 256], sizes = [8, 128], strides = [1, 1]} : vector<8x512xf32> to vector<8x128xf32>
    %175 = math.tanh %174 : vector<8x128xf32>
    %176 = vector.extract_strided_slice %161 {offsets = [0, 384], sizes = [8, 128], strides = [1, 1]} : vector<8x512xf32> to vector<8x128xf32>
    %177 = arith.negf %176 : vector<8x128xf32>
    %178 = math.exp %177 : vector<8x128xf32>
    %cst_48 = arith.constant 1.000000e+00 : f32
    %179 = vector.broadcast %cst_48 : f32 to vector<8x128xf32>
    %180 = arith.addf %179, %178 : vector<8x128xf32>
    %181 = arith.divf %179, %180 : vector<8x128xf32>
    %182 = arith.mulf %173, %147 : vector<8x128xf32>
    %183 = arith.mulf %167, %175 : vector<8x128xf32>
    %184 = arith.addf %182, %183 : vector<8x128xf32>
    %185 = math.tanh %184 : vector<8x128xf32>
    %186 = arith.mulf %181, %185 : vector<8x128xf32>
    %c4_49 = arith.constant 4 : index
    %c0_50 = arith.constant 0 : index
    %c0_51 = arith.constant 0 : index
    %187 = vector.load %arg4[%c4_49, %c0_50, %c0_51] : memref<8x8x128xf32, #tpu.memory_space<vmem>>, vector<1x8x128xf32>
    %188 = vector.shape_cast %187 : vector<1x8x128xf32> to vector<8x128xf32>
    %189 = vector.shape_cast %186 : vector<8x128xf32> to vector<1x8x128xf32>
    tpu.vector_store %arg4[%c4_49, %c0_50, %c0_51], %189 {strides = array<i32>} : memref<8x8x128xf32, #tpu.memory_space<vmem>>, vector<1x8x128xf32>,
    %c5 = arith.constant 5 : index
    %c0_52 = arith.constant 0 : index
    %c0_53 = arith.constant 0 : index
    %190 = vector.load %arg0[%c5, %c0_52, %c0_53] : memref<8x8x1xf32, #tpu.memory_space<vmem>>, vector<1x8x1xf32>
    %191 = vector.shape_cast %190 : vector<1x8x1xf32> to vector<8x1xf32>
    %192 = vector.broadcast %191 : vector<8x1xf32> to vector<8x512xf32>
    %193 = vector.broadcast %0 : vector<1x512xf32> to vector<8x512xf32>
    %194 = arith.mulf %192, %193 : vector<8x512xf32>
    %195 = vector.broadcast %1 : vector<1x512xf32> to vector<8x512xf32>
    %196 = arith.addf %194, %195 : vector<8x512xf32>
    %cst_54 = arith.constant dense<0.000000e+00> : vector<8x512xf32>
    %197 = tpu.matmul %186, %2, %cst_54 {dimension_numbers = #tpu.dot_dimension_numbers<[1], [0], [0], [1], [0, 0, 1, 1], [], []>} : vector<8x128xf32>, vector<128x512xf32>, vector<8x512xf32> -> vector<8x512xf32>
    %198 = arith.addf %196, %197 : vector<8x512xf32>
    %199 = vector.extract_strided_slice %198 {offsets = [0, 0], sizes = [8, 128], strides = [1, 1]} : vector<8x512xf32> to vector<8x128xf32>
    %200 = arith.negf %199 : vector<8x128xf32>
    %201 = math.exp %200 : vector<8x128xf32>
    %cst_55 = arith.constant 1.000000e+00 : f32
    %202 = vector.broadcast %cst_55 : f32 to vector<8x128xf32>
    %203 = arith.addf %202, %201 : vector<8x128xf32>
    %204 = arith.divf %202, %203 : vector<8x128xf32>
    %205 = vector.extract_strided_slice %198 {offsets = [0, 128], sizes = [8, 128], strides = [1, 1]} : vector<8x512xf32> to vector<8x128xf32>
    %206 = arith.negf %205 : vector<8x128xf32>
    %207 = math.exp %206 : vector<8x128xf32>
    %cst_56 = arith.constant 1.000000e+00 : f32
    %208 = vector.broadcast %cst_56 : f32 to vector<8x128xf32>
    %209 = arith.addf %208, %207 : vector<8x128xf32>
    %210 = arith.divf %208, %209 : vector<8x128xf32>
    %211 = vector.extract_strided_slice %198 {offsets = [0, 256], sizes = [8, 128], strides = [1, 1]} : vector<8x512xf32> to vector<8x128xf32>
    %212 = math.tanh %211 : vector<8x128xf32>
    %213 = vector.extract_strided_slice %198 {offsets = [0, 384], sizes = [8, 128], strides = [1, 1]} : vector<8x512xf32> to vector<8x128xf32>
    %214 = arith.negf %213 : vector<8x128xf32>
    %215 = math.exp %214 : vector<8x128xf32>
    %cst_57 = arith.constant 1.000000e+00 : f32
    %216 = vector.broadcast %cst_57 : f32 to vector<8x128xf32>
    %217 = arith.addf %216, %215 : vector<8x128xf32>
    %218 = arith.divf %216, %217 : vector<8x128xf32>
    %219 = arith.mulf %210, %184 : vector<8x128xf32>
    %220 = arith.mulf %204, %212 : vector<8x128xf32>
    %221 = arith.addf %219, %220 : vector<8x128xf32>
    %222 = math.tanh %221 : vector<8x128xf32>
    %223 = arith.mulf %218, %222 : vector<8x128xf32>
    %c5_58 = arith.constant 5 : index
    %c0_59 = arith.constant 0 : index
    %c0_60 = arith.constant 0 : index
    %224 = vector.load %arg4[%c5_58, %c0_59, %c0_60] : memref<8x8x128xf32, #tpu.memory_space<vmem>>, vector<1x8x128xf32>
    %225 = vector.shape_cast %224 : vector<1x8x128xf32> to vector<8x128xf32>
    %226 = vector.shape_cast %223 : vector<8x128xf32> to vector<1x8x128xf32>
    tpu.vector_store %arg4[%c5_58, %c0_59, %c0_60], %226 {strides = array<i32>} : memref<8x8x128xf32, #tpu.memory_space<vmem>>, vector<1x8x128xf32>,
    %c6 = arith.constant 6 : index
    %c0_61 = arith.constant 0 : index
    %c0_62 = arith.constant 0 : index
    %227 = vector.load %arg0[%c6, %c0_61, %c0_62] : memref<8x8x1xf32, #tpu.memory_space<vmem>>, vector<1x8x1xf32>
    %228 = vector.shape_cast %227 : vector<1x8x1xf32> to vector<8x1xf32>
    %229 = vector.broadcast %228 : vector<8x1xf32> to vector<8x512xf32>
    %230 = vector.broadcast %0 : vector<1x512xf32> to vector<8x512xf32>
    %231 = arith.mulf %229, %230 : vector<8x512xf32>
    %232 = vector.broadcast %1 : vector<1x512xf32> to vector<8x512xf32>
    %233 = arith.addf %231, %232 : vector<8x512xf32>
    %cst_63 = arith.constant dense<0.000000e+00> : vector<8x512xf32>
    %234 = tpu.matmul %223, %2, %cst_63 {dimension_numbers = #tpu.dot_dimension_numbers<[1], [0], [0], [1], [0, 0, 1, 1], [], []>} : vector<8x128xf32>, vector<128x512xf32>, vector<8x512xf32> -> vector<8x512xf32>
    %235 = arith.addf %233, %234 : vector<8x512xf32>
    %236 = vector.extract_strided_slice %235 {offsets = [0, 0], sizes = [8, 128], strides = [1, 1]} : vector<8x512xf32> to vector<8x128xf32>
    %237 = arith.negf %236 : vector<8x128xf32>
    %238 = math.exp %237 : vector<8x128xf32>
    %cst_64 = arith.constant 1.000000e+00 : f32
    %239 = vector.broadcast %cst_64 : f32 to vector<8x128xf32>
    %240 = arith.addf %239, %238 : vector<8x128xf32>
    %241 = arith.divf %239, %240 : vector<8x128xf32>
    %242 = vector.extract_strided_slice %235 {offsets = [0, 128], sizes = [8, 128], strides = [1, 1]} : vector<8x512xf32> to vector<8x128xf32>
    %243 = arith.negf %242 : vector<8x128xf32>
    %244 = math.exp %243 : vector<8x128xf32>
    %cst_65 = arith.constant 1.000000e+00 : f32
    %245 = vector.broadcast %cst_65 : f32 to vector<8x128xf32>
    %246 = arith.addf %245, %244 : vector<8x128xf32>
    %247 = arith.divf %245, %246 : vector<8x128xf32>
    %248 = vector.extract_strided_slice %235 {offsets = [0, 256], sizes = [8, 128], strides = [1, 1]} : vector<8x512xf32> to vector<8x128xf32>
    %249 = math.tanh %248 : vector<8x128xf32>
    %250 = vector.extract_strided_slice %235 {offsets = [0, 384], sizes = [8, 128], strides = [1, 1]} : vector<8x512xf32> to vector<8x128xf32>
    %251 = arith.negf %250 : vector<8x128xf32>
    %252 = math.exp %251 : vector<8x128xf32>
    %cst_66 = arith.constant 1.000000e+00 : f32
    %253 = vector.broadcast %cst_66 : f32 to vector<8x128xf32>
    %254 = arith.addf %253, %252 : vector<8x128xf32>
    %255 = arith.divf %253, %254 : vector<8x128xf32>
    %256 = arith.mulf %247, %221 : vector<8x128xf32>
    %257 = arith.mulf %241, %249 : vector<8x128xf32>
    %258 = arith.addf %256, %257 : vector<8x128xf32>
    %259 = math.tanh %258 : vector<8x128xf32>
    %260 = arith.mulf %255, %259 : vector<8x128xf32>
    %c6_67 = arith.constant 6 : index
    %c0_68 = arith.constant 0 : index
    %c0_69 = arith.constant 0 : index
    %261 = vector.load %arg4[%c6_67, %c0_68, %c0_69] : memref<8x8x128xf32, #tpu.memory_space<vmem>>, vector<1x8x128xf32>
    %262 = vector.shape_cast %261 : vector<1x8x128xf32> to vector<8x128xf32>
    %263 = vector.shape_cast %260 : vector<8x128xf32> to vector<1x8x128xf32>
    tpu.vector_store %arg4[%c6_67, %c0_68, %c0_69], %263 {strides = array<i32>} : memref<8x8x128xf32, #tpu.memory_space<vmem>>, vector<1x8x128xf32>,
    %c7 = arith.constant 7 : index
    %c0_70 = arith.constant 0 : index
    %c0_71 = arith.constant 0 : index
    %264 = vector.load %arg0[%c7, %c0_70, %c0_71] : memref<8x8x1xf32, #tpu.memory_space<vmem>>, vector<1x8x1xf32>
    %265 = vector.shape_cast %264 : vector<1x8x1xf32> to vector<8x1xf32>
    %266 = vector.broadcast %265 : vector<8x1xf32> to vector<8x512xf32>
    %267 = vector.broadcast %0 : vector<1x512xf32> to vector<8x512xf32>
    %268 = arith.mulf %266, %267 : vector<8x512xf32>
    %269 = vector.broadcast %1 : vector<1x512xf32> to vector<8x512xf32>
    %270 = arith.addf %268, %269 : vector<8x512xf32>
    %cst_72 = arith.constant dense<0.000000e+00> : vector<8x512xf32>
    %271 = tpu.matmul %260, %2, %cst_72 {dimension_numbers = #tpu.dot_dimension_numbers<[1], [0], [0], [1], [0, 0, 1, 1], [], []>} : vector<8x128xf32>, vector<128x512xf32>, vector<8x512xf32> -> vector<8x512xf32>
    %272 = arith.addf %270, %271 : vector<8x512xf32>
    %273 = vector.extract_strided_slice %272 {offsets = [0, 0], sizes = [8, 128], strides = [1, 1]} : vector<8x512xf32> to vector<8x128xf32>
    %274 = arith.negf %273 : vector<8x128xf32>
    %275 = math.exp %274 : vector<8x128xf32>
    %cst_73 = arith.constant 1.000000e+00 : f32
    %276 = vector.broadcast %cst_73 : f32 to vector<8x128xf32>
    %277 = arith.addf %276, %275 : vector<8x128xf32>
    %278 = arith.divf %276, %277 : vector<8x128xf32>
    %279 = vector.extract_strided_slice %272 {offsets = [0, 128], sizes = [8, 128], strides = [1, 1]} : vector<8x512xf32> to vector<8x128xf32>
    %280 = arith.negf %279 : vector<8x128xf32>
    %281 = math.exp %280 : vector<8x128xf32>
    %cst_74 = arith.constant 1.000000e+00 : f32
    %282 = vector.broadcast %cst_74 : f32 to vector<8x128xf32>
    %283 = arith.addf %282, %281 : vector<8x128xf32>
    %284 = arith.divf %282, %283 : vector<8x128xf32>
    %285 = vector.extract_strided_slice %272 {offsets = [0, 256], sizes = [8, 128], strides = [1, 1]} : vector<8x512xf32> to vector<8x128xf32>
    %286 = math.tanh %285 : vector<8x128xf32>
    %287 = vector.extract_strided_slice %272 {offsets = [0, 384], sizes = [8, 128], strides = [1, 1]} : vector<8x512xf32> to vector<8x128xf32>
    %288 = arith.negf %287 : vector<8x128xf32>
    %289 = math.exp %288 : vector<8x128xf32>
    %cst_75 = arith.constant 1.000000e+00 : f32
    %290 = vector.broadcast %cst_75 : f32 to vector<8x128xf32>
    %291 = arith.addf %290, %289 : vector<8x128xf32>
    %292 = arith.divf %290, %291 : vector<8x128xf32>
    %293 = arith.mulf %284, %258 : vector<8x128xf32>
    %294 = arith.mulf %278, %286 : vector<8x128xf32>
    %295 = arith.addf %293, %294 : vector<8x128xf32>
    %296 = math.tanh %295 : vector<8x128xf32>
    %297 = arith.mulf %292, %296 : vector<8x128xf32>
    %c7_76 = arith.constant 7 : index
    %c0_77 = arith.constant 0 : index
    %c0_78 = arith.constant 0 : index
    %298 = vector.load %arg4[%c7_76, %c0_77, %c0_78] : memref<8x8x128xf32, #tpu.memory_space<vmem>>, vector<1x8x128xf32>
    %299 = vector.shape_cast %298 : vector<1x8x128xf32> to vector<8x128xf32>
    %300 = vector.shape_cast %297 : vector<8x128xf32> to vector<1x8x128xf32>
    tpu.vector_store %arg4[%c7_76, %c0_77, %c0_78], %300 {strides = array<i32>} : memref<8x8x128xf32, #tpu.memory_space<vmem>>, vector<1x8x128xf32>,
    return
  }
}

</mosaic_0001>

<bundles_post_ra>
// kernel: air_model_forward.1
= control target key start
LH: loop header
LB: loop body
LE: loop exit
PB: predicated region body
PF: predicated region fallthrough
CT: control target
= control target key end

     0   :  { %v2999_v3 = vmov 0   ;;  %s2994_s3 = inlined_call_operand.vmem [shape: f32[128,512], index: 3, kind: input, shape index: {}]   ;;  %s2995_s0 = inlined_call_operand.vmem [shape: f32[8,8,1], index: 0, kind: input, shape index: {}]   ;;  %s2996_s1 = inlined_call_operand.vmem [shape: f32[1,512], index: 1, kind: input, shape index: {}]   ;;  %s2997_s2 = inlined_call_operand.vmem [shape: f32[1,512], index: 2, kind: input, shape index: {}]   ;;  %s2998_s4 = inlined_call_operand.vmem [shape: f32[8,8,128], index: 4, kind: output, shape index: {}]  }
   0x1   :  { %v1680_v0 = vld [vmem:[%s2994_s3 + $0x1e0] sm:$0xff]  ;;  %v1685_v1 = vld [vmem:[%s2994_s3 + $0x1e8] sm:$0xff]  ;;  %v1690_v2 = vld [vmem:[%s2994_s3 + $0x1f0] sm:$0xff]  ;;  %1455 = vset.pattern.permute.xlu0 %v2999_v3  ;;  %1456 = vset.pattern.permute.xlu1 %v2999_v3 }
   0x2   :  { %115 = vmatpush.msra.mxu0 %v1680_v0  ;;  %135 = vmatpush.msra.mxu1 %v1685_v1  ;;  %v1699_v4 = vld [vmem:[%s2994_s3 + $0x1f8] sm:$0xff]  ;;  %v1704_v5 = vld [vmem:[%s2994_s3 + $0x1c0] sm:$0xff]  ;;  %v1709_v6 = vld [vmem:[%s2994_s3 + $0x1c8] sm:$0xff] }
   0x3   :  { %155 = vmatpush.msra.mxu2 %v1690_v2  ;;  %175 = vmatpush.msra.mxu3 %v1699_v4  ;;  %v1716_v7 = vld [vmem:[%s2994_s3 + $0x1d0] sm:$0xff]  ;;  %v1721_v8 = vld [vmem:[%s2994_s3 + $0x1d8] sm:$0xff]  ;;  %v1726_v9 = vld [vmem:[%s2994_s3 + $0x1a0] sm:$0xff] }
   0x4   :  { %116 = vmatpush.msra.mxu0 %v1704_v5  ;;  %136 = vmatpush.msra.mxu1 %v1709_v6  ;;  %v1733_v10 = vld [vmem:[%s2994_s3 + $0x1a8] sm:$0xff]  ;;  %v1738_v11 = vld [vmem:[%s2994_s3 + $0x1b0] sm:$0xff]  ;;  %v1743_v12 = vld [vmem:[%s2994_s3 + $0x1b8] sm:$0xff] }
   0x5   :  { %156 = vmatpush.msra.mxu2 %v1716_v7  ;;  %176 = vmatpush.msra.mxu3 %v1721_v8  ;;  %v1750_v13 = vld [vmem:[%s2994_s3 + $0x180] sm:$0xff]  ;;  %v1755_v14 = vld [vmem:[%s2994_s3 + $0x188] sm:$0xff]  ;;  %v1762_v15 = vld [vmem:[%s2994_s3 + $0x190] sm:$0xff] }
   0x6   :  { %117 = vmatpush.msra.mxu0 %v1726_v9  ;;  %137 = vmatpush.msra.mxu1 %v1733_v10  ;;  %v1767_v16 = vld [vmem:[%s2994_s3 + $0x198] sm:$0xff]  ;;  %v1774_v17 = vld [vmem:[%s2994_s3 + $0x160] sm:$0xff]  ;;  %v1779_v18 = vld [vmem:[%s2994_s3 + $0x168] sm:$0xff] }
   0x7   :  { %157 = vmatpush.msra.mxu2 %v1738_v11  ;;  %177 = vmatpush.msra.mxu3 %v1743_v12  ;;  %v1786_v19 = vld [vmem:[%s2994_s3 + $0x170] sm:$0xff]  ;;  %v1791_v20 = vld [vmem:[%s2994_s3 + $0x178] sm:$0xff]  ;;  %v1798_v21 = vld [vmem:[%s2994_s3 + $0x140] sm:$0xff] }
   0x8   :  { %118 = vmatpush.msra.mxu0 %v1750_v13  ;;  %138 = vmatpush.msra.mxu1 %v1755_v14  ;;  %v1803_v22 = vld [vmem:[%s2994_s3 + $0x148] sm:$0xff]  ;;  %v1810_v23 = vld [vmem:[%s2994_s3 + $0x150] sm:$0xff]  ;;  %v1815_v24 = vld [vmem:[%s2994_s3 + $0x158] sm:$0xff] }
   0x9   :  { %158 = vmatpush.msra.mxu2 %v1762_v15  ;;  %178 = vmatpush.msra.mxu3 %v1767_v16  ;;  %v1822_v25 = vld [vmem:[%s2994_s3 + $0x120] sm:$0xff]  ;;  %v1827_v26 = vld [vmem:[%s2994_s3 + $0x128] sm:$0xff]  ;;  %v1834_v27 = vld [vmem:[%s2994_s3 + $0x130] sm:$0xff] }
   0xa   :  { %119 = vmatpush.msra.mxu0 %v1774_v17  ;;  %139 = vmatpush.msra.mxu1 %v1779_v18  ;;  %v1839_v28 = vld [vmem:[%s2994_s3 + $0x138] sm:$0xff]  ;;  %v1846_v29 = vld [vmem:[%s2994_s3 + $0x100] sm:$0xff]  ;;  %v1851_v30 = vld [vmem:[%s2994_s3 + $0x108] sm:$0xff] }
   0xb   :  { %159 = vmatpush.msra.mxu2 %v1786_v19  ;;  %179 = vmatpush.msra.mxu3 %v1791_v20  ;;  %v1858_v31 = vld [vmem:[%s2994_s3 + $0x110] sm:$0xff]  ;;  %v1863_v32 = vld [vmem:[%s2994_s3 + $0x118] sm:$0xff]  ;;  %v1870_v33 = vld [vmem:[%s2994_s3 + $0xe0] sm:$0xff] }
   0xc   :  { %120 = vmatpush.msra.mxu0 %v1798_v21  ;;  %140 = vmatpush.msra.mxu1 %v1803_v22  ;;  %v1875_v34 = vld [vmem:[%s2994_s3 + $0xe8] sm:$0xff]  ;;  %v1882_v35 = vld [vmem:[%s2994_s3 + $0xf0] sm:$0xff]  ;;  %v1887_v36 = vld [vmem:[%s2994_s3 + $0xf8] sm:$0xff] }
   0xd   :  { %160 = vmatpush.msra.mxu2 %v1810_v23  ;;  %180 = vmatpush.msra.mxu3 %v1815_v24  ;;  %v1894_v37 = vld [vmem:[%s2994_s3 + $0xc0] sm:$0xff]  ;;  %v1899_v38 = vld [vmem:[%s2994_s3 + $0xc8] sm:$0xff]  ;;  %v1906_v39 = vld [vmem:[%s2994_s3 + $0xd0] sm:$0xff] }
   0xe   :  { %121 = vmatpush.msra.mxu0 %v1822_v25  ;;  %141 = vmatpush.msra.mxu1 %v1827_v26  ;;  %3131 = vst [vmem:[#allocation2_spill] sm:$0xff] %v1906_v39  ;;  %v1911_v40 = vld [vmem:[%s2994_s3 + $0xd8] sm:$0xff]  ;;  %v1918_v41 = vld [vmem:[%s2994_s3 + $0xa0] sm:$0xff]  ;;  %v1923_v42 = vld [vmem:[%s2994_s3 + $0xa8] sm:$0xff] }
   0xf   :  { %161 = vmatpush.msra.mxu2 %v1834_v27  ;;  %181 = vmatpush.msra.mxu3 %v1839_v28  ;;  %3132 = vst [vmem:[#allocation3_spill] sm:$0xff] %v1911_v40  ;;  %v1930_v43 = vld [vmem:[%s2994_s3 + $0xb0] sm:$0xff]  ;;  %v1935_v44 = vld [vmem:[%s2994_s3 + $0xb8] sm:$0xff]  ;;  %v1942_v45 = vld [vmem:[%s2994_s3 + $0x80] sm:$0xff] }
  0x10   :  { %122 = vmatpush.msra.mxu0 %v1846_v29  ;;  %142 = vmatpush.msra.mxu1 %v1851_v30  ;;  %3133 = vst [vmem:[#allocation4_spill] sm:$0xff] %v1918_v41  ;;  %v1947_v46 = vld [vmem:[%s2994_s3 + $0x88] sm:$0xff]  ;;  %v1954_v47 = vld [vmem:[%s2994_s3 + $0x90] sm:$0xff]  ;;  %v1959_v48 = vld [vmem:[%s2994_s3 + $0x98] sm:$0xff] }
  0x11   :  { %162 = vmatpush.msra.mxu2 %v1858_v31  ;;  %182 = vmatpush.msra.mxu3 %v1863_v32  ;;  %3134 = vst [vmem:[#allocation5_spill] sm:$0xff] %v1923_v42  ;;  %v83_v49 = vld [vmem:[%s2995_s0] sm:$0xff]  ;;  %v1976_v51 = vld [vmem:[%s2994_s3 + $0x68] sm:$0xff]  ;;  %v1981_v52 = vld [vmem:[%s2994_s3 + $0x70] sm:$0xff] }
  0x12   :  { %123 = vmatpush.msra.mxu0 %v1870_v33  ;;  %143 = vmatpush.msra.mxu1 %v1875_v34  ;;  %3135 = vst [vmem:[#allocation6_spill] sm:$0xff] %v1930_v43  ;;  %v1969_v50 = vld [vmem:[%s2994_s3 + $0x60] sm:$0xff]  ;;  %v1988_v53 = vld [vmem:[%s2994_s3 + $0x78] sm:$0xff]  ;;  %v1999_v55 = vld [vmem:[%s2994_s3 + $0x48] sm:$0xff] }
  0x13   :  { %163 = vmatpush.msra.mxu2 %v1882_v35  ;;  %183 = vmatpush.msra.mxu3 %v1887_v36  ;;  %3136 = vst [vmem:[#allocation7_spill] sm:$0xff] %v1935_v44  ;;  %v1993_v54 = vld [vmem:[%s2994_s3 + $0x40] sm:$0xff]  ;;  %v2004_v56 = vld [vmem:[%s2994_s3 + $0x50] sm:$0xff]  ;;  %v2011_v57 = vld [vmem:[%s2994_s3 + $0x58] sm:$0xff] }
  0x14   :  { %124 = vmatpush.msra.mxu0 %v1894_v37  ;;  %144 = vmatpush.msra.mxu1 %v1899_v38  ;;  %3137 = vst [vmem:[#allocation8_spill] sm:$0xff] %v1942_v45  ;;  %v2016_v58 = vld [vmem:[%s2994_s3 + $0x20] sm:$0xff]  ;;  %v2023_v59 = vld [vmem:[%s2994_s3 + $0x28] sm:$0xff]  ;;  %v2028_v60 = vld [vmem:[%s2994_s3 + $0x30] sm:$0xff] }
  0x15   :  { %164 = vmatpush.msra.mxu2 %v1906_v39  ;;  %184 = vmatpush.msra.mxu3 %v1911_v40  ;;  %3138 = vst [vmem:[#allocation9_spill] sm:$0xff] %v1947_v46  ;;  %v2035_v61 = vld [vmem:[%s2994_s3 + $0x38] sm:$0xff]  ;;  %v2040_v62 = vld [vmem:[%s2994_s3] sm:$0xff]  ;;  %v2047_v63 = vld [vmem:[%s2994_s3 + $0x8] sm:$0xff] }
  0x16   :  { %125 = vmatpush.msra.mxu0 %v1918_v41  ;;  %145 = vmatpush.msra.mxu1 %v1923_v42  ;;  %3139 = vst [vmem:[#allocation10_spill] sm:$0xff] %v1954_v47  ;;  %v2059_v3 = vld [vmem:[%s2994_s3 + $0x18] sm:$0xff] }
  0x17   :  { %3140 = vst [vmem:[#allocation11_spill] sm:$0xff] %v1959_v48  ;;  %165 = vmatpush.msra.mxu2 %v1930_v43  ;;  %185 = vmatpush.msra.mxu3 %v1935_v44 }
  0x18   :  { %3141 = vst [vmem:[#allocation12_spill] sm:$0xff] %v1969_v50  ;;  %126 = vmatpush.msra.mxu0 %v1942_v45  ;;  %146 = vmatpush.msra.mxu1 %v1947_v46 }
  0x19   :  { %3142 = vst [vmem:[#allocation13_spill] sm:$0xff] %v1976_v51  ;;  %166 = vmatpush.msra.mxu2 %v1954_v47  ;;  %186 = vmatpush.msra.mxu3 %v1959_v48 }
  0x1a   :  { %3143 = vst [vmem:[#allocation14_spill] sm:$0xff] %v1981_v52  ;;  %86 = vperm.xlu0 %1455, %v83_v49   ;;  %127 = vmatpush.msra.mxu0 %v1969_v50  ;;  %v2052_v49 = vld [vmem:[%s2994_s3 + $0x10] sm:$0xff] }
  0x1b   :  { %3144 = vst [vmem:[#allocation15_spill] sm:$0xff] %v1988_v53  ;;  %147 = vmatpush.msra.mxu1 %v1976_v51  ;;  %167 = vmatpush.msra.mxu2 %v1981_v52 }
  0x1c   :  { %3145 = vst [vmem:[#allocation16_spill] sm:$0xff] %v1993_v54  ;;  %187 = vmatpush.msra.mxu3 %v1988_v53  ;;  %128 = vmatpush.msra.mxu0 %v1993_v54 }
  0x1d   :  { %3146 = vst [vmem:[#allocation17_spill] sm:$0xff] %v1999_v55  ;;  %148 = vmatpush.msra.mxu1 %v1999_v55  ;;  %168 = vmatpush.msra.mxu2 %v2004_v56 }
  0x1e   :  { %3147 = vst [vmem:[#allocation18_spill] sm:$0xff] %v2004_v56  ;;  %188 = vmatpush.msra.mxu3 %v2011_v57  ;;  %129 = vmatpush.msra.mxu0 %v2016_v58 }
  0x1f   :  { %3148 = vst [vmem:[#allocation19_spill] sm:$0xff] %v2011_v57  ;;  %149 = vmatpush.msra.mxu1 %v2023_v59  ;;  %169 = vmatpush.msra.mxu2 %v2028_v60 }
  0x20   :  { %3149 = vst [vmem:[#allocation20_spill] sm:$0xff] %v2016_v58  ;;  %v1418_v58 = vld [vmem:[%s2995_s0 + $0x8] sm:$0xff]  ;;  %189 = vmatpush.msra.mxu3 %v2035_v61  ;;  %130 = vmatpush.msra.mxu0 %v2040_v62 }
  0x21   :  { %3150 = vst [vmem:[#allocation21_spill] sm:$0xff] %v2023_v59  ;;  %150 = vmatpush.msra.mxu1 %v2047_v63  ;;  %170 = vmatpush.msra.mxu2 %v2052_v49 }
  0x22   :  { %3151 = vst [vmem:[#allocation22_spill] sm:$0xff] %v2028_v60  ;;  %190 = vmatpush.msra.mxu3 %v2059_v3  ;;  %267 = vperm.xlu0 %1455, %v1418_v58   ;;  %v1651_v60 = vmov 0.0  }
  0x23   :  { %3152 = vst [vmem:[#allocation23_spill] sm:$0xff] %v2035_v61  ;;  %131 = vmatmul.f32.vlgmr.msra.gmra.mxu0 %v1651_v60  ;;  %151 = vmatmul.f32.vlgmr.msra.gmra.mxu1 %v1651_v60 }
  0x24   :  { %3153 = vst [vmem:[#allocation24_spill] sm:$0xff] %v2040_v62  ;;  %171 = vmatmul.f32.vlgmr.msra.gmra.mxu2 %v1651_v60  ;;  %191 = vmatmul.f32.vlgmr.msra.gmra.mxu3 %v1651_v60 }
  0x25   :  { %3154 = vst [vmem:[#allocation25_spill] sm:$0xff] %v2047_v63  ;;  %278 = vmatpush.msrb.mxu0 %v1680_v0  ;;  %298 = vmatpush.msrb.mxu1 %v1685_v1 }
  0x26   :  { %3155 = vst [vmem:[#allocation26_spill] sm:$0xff] %v2052_v49  ;;  %318 = vmatpush.msrb.mxu2 %v1690_v2  ;;  %338 = vmatpush.msrb.mxu3 %v1699_v4  ;;  %v1443_v49 = vld [vmem:[%s2995_s0 + $0x30] sm:$0xff] }
  0x27   :  { %3156 = vst [vmem:[#allocation27_spill] sm:$0xff] %v2059_v3  ;;  %279 = vmatpush.msrb.mxu0 %v1704_v5  ;;  %299 = vmatpush.msrb.mxu1 %v1709_v6  ;;  %v3157_v58 = vld [vmem:[#allocation20_spill] sm:$0xff] }
  0x28   :  { %319 = vmatpush.msrb.mxu2 %v1716_v7  ;;  %339 = vmatpush.msrb.mxu3 %v1721_v8 }
  0x29   :  { %280 = vmatpush.msrb.mxu0 %v1726_v9  ;;  %300 = vmatpush.msrb.mxu1 %v1733_v10  ;;  %v3158_v60 = vld [vmem:[#allocation22_spill] sm:$0xff] }
  0x2a   :  { %1087 = vperm.xlu0 %1455, %v1443_v49   ;;  %320 = vmatpush.msrb.mxu2 %v1738_v11 }
  0x2b   :  { %340 = vmatpush.msrb.mxu3 %v1743_v12  ;;  %281 = vmatpush.msrb.mxu0 %v1750_v13 }
  0x2c   :  { %301 = vmatpush.msrb.mxu1 %v1755_v14  ;;  %321 = vmatpush.msrb.mxu2 %v1762_v15 }
  0x2d   :  { %341 = vmatpush.msrb.mxu3 %v1767_v16  ;;  %282 = vmatpush.msrb.mxu0 %v1774_v17  ;;  %v3159_v49 = vld [vmem:[#allocation26_spill] sm:$0xff] }
  0x2e   :  { %302 = vmatpush.msrb.mxu1 %v1779_v18  ;;  %322 = vmatpush.msrb.mxu2 %v1786_v19 }
  0x2f   :  { %342 = vmatpush.msrb.mxu3 %v1791_v20  ;;  %283 = vmatpush.msrb.mxu0 %v1798_v21 }
  0x30   :  { %303 = vmatpush.msrb.mxu1 %v1803_v22  ;;  %323 = vmatpush.msrb.mxu2 %v1810_v23 }
  0x31   :  { %343 = vmatpush.msrb.mxu3 %v1815_v24  ;;  %284 = vmatpush.msrb.mxu0 %v1822_v25 }
  0x32   :  { %304 = vmatpush.msrb.mxu1 %v1827_v26  ;;  %324 = vmatpush.msrb.mxu2 %v1834_v27 }
  0x33   :  { %344 = vmatpush.msrb.mxu3 %v1839_v28  ;;  %285 = vmatpush.msrb.mxu0 %v1846_v29 }
  0x34   :  { %305 = vmatpush.msrb.mxu1 %v1851_v30  ;;  %325 = vmatpush.msrb.mxu2 %v1858_v31 }
  0x35   :  { %345 = vmatpush.msrb.mxu3 %v1863_v32  ;;  %286 = vmatpush.msrb.mxu0 %v1870_v33 }
  0x36   :  { %306 = vmatpush.msrb.mxu1 %v1875_v34  ;;  %326 = vmatpush.msrb.mxu2 %v1882_v35 }
  0x37   :  { %346 = vmatpush.msrb.mxu3 %v1887_v36  ;;  %287 = vmatpush.msrb.mxu0 %v1894_v37 }
  0x38   :  { %307 = vmatpush.msrb.mxu1 %v1899_v38  ;;  %327 = vmatpush.msrb.mxu2 %v1906_v39 }
  0x39   :  { %347 = vmatpush.msrb.mxu3 %v1911_v40  ;;  %288 = vmatpush.msrb.mxu0 %v1918_v41 }
  0x3a   :  { %308 = vmatpush.msrb.mxu1 %v1923_v42  ;;  %328 = vmatpush.msrb.mxu2 %v1930_v43 }
  0x3b   :  { %348 = vmatpush.msrb.mxu3 %v1935_v44  ;;  %289 = vmatpush.msrb.mxu0 %v1942_v45 }
  0x3c   :  { %309 = vmatpush.msrb.mxu1 %v1947_v46  ;;  %329 = vmatpush.msrb.mxu2 %v1954_v47 }
  0x3d   :  { %349 = vmatpush.msrb.mxu3 %v1959_v48  ;;  %290 = vmatpush.msrb.mxu0 %v1969_v50 }
  0x3e   :  { %310 = vmatpush.msrb.mxu1 %v1976_v51  ;;  %330 = vmatpush.msrb.mxu2 %v1981_v52 }
  0x3f   :  { %350 = vmatpush.msrb.mxu3 %v1988_v53  ;;  %291 = vmatpush.msrb.mxu0 %v1993_v54 }
  0x40   :  { %311 = vmatpush.msrb.mxu1 %v1999_v55  ;;  %331 = vmatpush.msrb.mxu2 %v2004_v56 }
  0x41   :  { %351 = vmatpush.msrb.mxu3 %v2011_v57  ;;  %292 = vmatpush.msrb.mxu0 %v3157_v58 }
  0x42   :  { %312 = vmatpush.msrb.mxu1 %v2023_v59  ;;  %332 = vmatpush.msrb.mxu2 %v3158_v60 }
  0x43   :  { %352 = vmatpush.msrb.mxu3 %v2035_v61  ;;  %293 = vmatpush.msrb.mxu0 %v2040_v62 }
  0x44   :  { %313 = vmatpush.msrb.mxu1 %v2047_v63  ;;  %333 = vmatpush.msrb.mxu2 %v3159_v49 }
  0x45   :  { %353 = vmatpush.msrb.mxu3 %v2059_v3  ;;  %442 = vmatpush.msra.mxu0 %v1680_v0 }
  0x46   :  { %462 = vmatpush.msra.mxu1 %v1685_v1  ;;  %482 = vmatpush.msra.mxu2 %v1690_v2 }
  0x47   :  { %502 = vmatpush.msra.mxu3 %v1699_v4  ;;  %443 = vmatpush.msra.mxu0 %v1704_v5 }
  0x48   :  { %463 = vmatpush.msra.mxu1 %v1709_v6  ;;  %483 = vmatpush.msra.mxu2 %v1716_v7 }
  0x49   :  { %503 = vmatpush.msra.mxu3 %v1721_v8  ;;  %444 = vmatpush.msra.mxu0 %v1726_v9 }
  0x4a   :  { %464 = vmatpush.msra.mxu1 %v1733_v10  ;;  %484 = vmatpush.msra.mxu2 %v1738_v11 }
  0x4b   :  { %504 = vmatpush.msra.mxu3 %v1743_v12  ;;  %445 = vmatpush.msra.mxu0 %v1750_v13 }
  0x4c   :  { %465 = vmatpush.msra.mxu1 %v1755_v14  ;;  %485 = vmatpush.msra.mxu2 %v1762_v15 }
  0x4d   :  { %505 = vmatpush.msra.mxu3 %v1767_v16  ;;  %446 = vmatpush.msra.mxu0 %v1774_v17 }
  0x4e   :  { %466 = vmatpush.msra.mxu1 %v1779_v18  ;;  %486 = vmatpush.msra.mxu2 %v1786_v19 }
  0x4f   :  { %506 = vmatpush.msra.mxu3 %v1791_v20  ;;  %447 = vmatpush.msra.mxu0 %v1798_v21 }
  0x50   :  { %467 = vmatpush.msra.mxu1 %v1803_v22  ;;  %487 = vmatpush.msra.mxu2 %v1810_v23 }
  0x51   :  { %507 = vmatpush.msra.mxu3 %v1815_v24  ;;  %448 = vmatpush.msra.mxu0 %v1822_v25 }
  0x52   :  { %468 = vmatpush.msra.mxu1 %v1827_v26  ;;  %488 = vmatpush.msra.mxu2 %v1834_v27 }
  0x53   :  { %508 = vmatpush.msra.mxu3 %v1839_v28  ;;  %449 = vmatpush.msra.mxu0 %v1846_v29 }
  0x54   :  { %469 = vmatpush.msra.mxu1 %v1851_v30  ;;  %489 = vmatpush.msra.mxu2 %v1858_v31 }
  0x55   :  { %509 = vmatpush.msra.mxu3 %v1863_v32  ;;  %450 = vmatpush.msra.mxu0 %v1870_v33 }
  0x56   :  { %470 = vmatpush.msra.mxu1 %v1875_v34  ;;  %490 = vmatpush.msra.mxu2 %v1882_v35 }
  0x57   :  { %510 = vmatpush.msra.mxu3 %v1887_v36  ;;  %451 = vmatpush.msra.mxu0 %v1894_v37 }
  0x58   :  { %471 = vmatpush.msra.mxu1 %v1899_v38  ;;  %491 = vmatpush.msra.mxu2 %v1906_v39 }
  0x59   :  { %511 = vmatpush.msra.mxu3 %v1911_v40  ;;  %452 = vmatpush.msra.mxu0 %v1918_v41 }
  0x5a   :  { %472 = vmatpush.msra.mxu1 %v1923_v42  ;;  %492 = vmatpush.msra.mxu2 %v1930_v43 }
  0x5b   :  { %512 = vmatpush.msra.mxu3 %v1935_v44  ;;  %453 = vmatpush.msra.mxu0 %v1942_v45 }
  0x5c   :  { %473 = vmatpush.msra.mxu1 %v1947_v46  ;;  %493 = vmatpush.msra.mxu2 %v1954_v47 }
  0x5d   :  { %513 = vmatpush.msra.mxu3 %v1959_v48  ;;  %454 = vmatpush.msra.mxu0 %v1969_v50 }
  0x5e   :  { %474 = vmatpush.msra.mxu1 %v1976_v51  ;;  %494 = vmatpush.msra.mxu2 %v1981_v52 }
  0x5f   :  { %514 = vmatpush.msra.mxu3 %v1988_v53  ;;  %455 = vmatpush.msra.mxu0 %v1993_v54 }
  0x60   :  { %475 = vmatpush.msra.mxu1 %v1999_v55  ;;  %495 = vmatpush.msra.mxu2 %v2004_v56  ;;  %v3160_v55 = vmov 0  }
  0x61   :  { %515 = vmatpush.msra.mxu3 %v2011_v57  ;;  %456 = vmatpush.msra.mxu0 %v3157_v58  ;;  %v17_v58 = vld [vmem:[%s2996_s1] sm:$0xf] }
  0x62   :  { %476 = vmatpush.msra.mxu1 %v2023_v59  ;;  %496 = vmatpush.msra.mxu2 %v3158_v60  ;;  %v2204_v57 = vperm.slane %v17_v58, 0  ;;  %v2206_v59 = vperm.slane %v17_v58, 1  ;;  %v2219_v54 = vperm.slane %v17_v58, 3 }
  0x63   :  { %516 = vmatpush.msra.mxu3 %v2035_v61  ;;  %457 = vmatpush.msra.mxu0 %v2040_v62  ;;  %v18_v62 = vld [vmem:[%s2997_s2] sm:$0xf] }
  0x64   :  { %477 = vmatpush.msra.mxu1 %v2047_v63  ;;  %497 = vmatpush.msra.mxu2 %v3159_v49  ;;  %3161 = vst [vmem:[#allocation28_spill] sm:$0xff] %v2204_v57  ;;  %v2212_v49 = vperm.slane %v18_v62, 0  ;;  %v2222_v47 = vperm.slane %v18_v62, 3 }
  0x65   :  { %517 = vmatpush.msra.mxu3 %v2059_v3  ;;  %1457 = vset.pattern.permute.xlu2 %v3160_v55  ;;  %3162 = vst [vmem:[#allocation29_spill] sm:$0xff] %v2206_v59  ;;  %v2215_v55 = vperm.slane %v18_v62, 1 }
  0x66   :  { %3163 = vst [vmem:[#allocation30_spill] sm:$0xff] %v2212_v49 }
  0x67   :  { %3164 = vst [vmem:[#allocation31_spill] sm:$0xff] %v2215_v55 }
  0x68   :  { %3165 = vst [vmem:[#allocation32_spill] sm:$0xff] %v2219_v54 }
  0x69   :  { %3166 = vst [vmem:[#allocation33_spill] sm:$0xff] %v2222_v47 }
  0x8c   :  { %v87_v61 = vpop.permute.xlu0 %86 }
  0x8d   :  { %v98_v63 = vmul.f32 %v2204_v57, %v87_v61  ;;  %v99_v3 = vmul.f32 %v2206_v59, %v87_v61  ;;  %v101_v48 = vmul.f32 %v2219_v54, %v87_v61 }
  0x8f   :  { %v111_v60 = vadd.f32 %v2212_v49, %v98_v63  ;;  %v112_v56 = vadd.f32 %v2215_v55, %v99_v3  ;;  %v114_v59 = vadd.f32 %v2222_v47, %v101_v48  ;;  %v2225_v49 = vperm.slane %v17_v58, 2 }
  0x91   :  { %3167 = vst [vmem:[#allocation34_spill] sm:$0xff] %v2225_v49 }
  0xa0   :  { %v132_v53 = vpop.f32.mrf.mxu0  ;;  %v152_v52 = vpop.f32.mrf.mxu1 }
  0xa1   :  { %v195_v51 = vadd.f32 %v132_v53, %v111_v60  ;;  %v196_v50 = vadd.f32 %v152_v52, %v112_v56  ;;  %v100_v53 = vmul.f32 %v2225_v49, %v87_v61  ;;  %v2228_v56 = vperm.slane %v18_v62, 2 }
  0xa3   :  { %v1415_v57 = vmul.f32 -1.442695, %v195_v51  ;;  %v1416_v46 = vmul.f32 -1.442695, %v196_v50  ;;  %3168 = vst [vmem:[#allocation35_spill] sm:$0xff] %v2228_v56  ;;  %v113_v48 = vadd.f32 %v2228_v56, %v100_v53 }
  0xa5   :  { %1458 = vpow2.f32 %v1415_v57 }
  0xa6   :  { %1460 = vpow2.f32 %v1416_v46 }
  0xa7   :  { %v192_v45 = vpop.f32.mrf.mxu3  ;;  %v172_v50 = vpop.f32.mrf.mxu2 }
  0xa8   :  { %v198_v63 = vadd.f32 %v192_v45, %v114_v59  ;;  %v197_v57 = vadd.f32 %v172_v50, %v113_v48 }
  0xaa   :  { %v1417_v3 = vmul.f32 -1.442695, %v198_v63 }
  0xab   :  { %v1459_v55 = vpop.eup %1458 }
  0xac   :  { %v1461_v44 = vpop.eup %1460  ;;  %v202_v43 = vadd.f32 1.0, %v1459_v55  ;;  %1462 = vpow2.f32 %v1417_v3 }
  0xad   :  { %v221_v52 = vadd.f32 1.0, %v1461_v44 }
  0xae   :  { %1464 = vrcp.f32 %v202_v43  ;;  %v214_v44 = vand.u32 2147483648, %v202_v43  ;;  %v212_v62 = vand.u32 2147483647, %v202_v43  ;;  %vm208_vm2 = vweird.f32 %v202_v43 }
  0xaf   :  { %1466 = vrcp.f32 %v221_v52  ;;  %v233_v3 = vand.u32 2147483648, %v221_v52  ;;  %v231_v47 = vand.u32 2147483647, %v221_v52  ;;  %vm227_vm3 = vweird.f32 %v221_v52 }
  0xb0   :  { %v215_v50 = vor.u32 1.1754944e-38, %v214_v44  ;;  %vm213_vm5 = vcmp.eq.f32.partialorder %v212_v62, 8.507059e+37  ;;  %v3195_v62 = vld [vmem:[#allocation28_spill] sm:$0xff] }
  0xb1   :  { %v234_v56 = vor.u32 1.1754944e-38, %v233_v3  ;;  %vm232_vm7 = vcmp.eq.f32.partialorder %v231_v47, 8.507059e+37 }
  0xb2   :  { %v1463_v46 = vpop.eup %1462 }
  0xb3   :  { %v241_v51 = vadd.f32 1.0, %v1463_v46 }
  0xb4   :  { %v1465_v45 = vpop.eup %1464 }
  0xb5   :  { %v1467_v59 = vpop.eup %1466  ;;  %v204_v58 = vmul.f32 %v1465_v45, %v202_v43  ;;  %1468 = vrcp.f32 %v241_v51  ;;  %vm209_vm0 = vweird.f32 %v1465_v45  ;;  %vm247_vm9 = vweird.f32 %v241_v51 }
  0xb6   :  { %v223_v60 = vmul.f32 %v1467_v59, %v221_v52  ;;  %1470 = vtanh.f32 %v197_v57  ;;  %vm228_vm1 = vweird.f32 %v1467_v59  ;;  %vm210_vm4 = vmor %vm208_vm2, %vm209_vm0  ;;  %v251_v52 = vand.u32 2147483647, %v241_v51 }
  0xb7   :  { %v205_v55 = vsub.f32 1.0, %v204_v58  ;;  %vm229_vm6 = vmor %vm227_vm3, %vm228_vm1 }
  0xb8   :  { %v224_v63 = vsub.f32 1.0, %v223_v60  ;;  %vm252_vm11 = vcmp.eq.f32.partialorder %v251_v52, 8.507059e+37  ;;  %v3199_v52 = vld [vmem:[#allocation32_spill] sm:$0xff] }
  0xb9   :  { %v206_v61 = vmul.f32 %v1465_v45, %v205_v55 }
  0xba   :  { %v225_v49 = vmul.f32 %v1467_v59, %v224_v63 }
  0xbb   :  { %v1469_v54 = vpop.eup %1468  ;;  %v207_v53 = vadd.f32 %v1465_v45, %v206_v61 }
  0xbc   :  { %v226_v46 = vadd.f32 %v1467_v59, %v225_v49  ;;  %v243_v48 = vmul.f32 %v1469_v54, %v241_v51  ;;  %v1471_v57 = vpop.eup %1470  ;;  %vm248_vm8 = vweird.f32 %v1469_v54  ;;  %v253_v49 = vand.u32 2147483648, %v241_v51  ;;  %v268_v51 = vpop.permute.xlu0 %267 }
  0xbd   :  { %v211_v58 = vsel %vm210_vm4, %v1465_v45, %v207_v53  ;;  %vm249_vm10 = vmor %vm247_vm9, %vm248_vm8  ;;  %v270_v53 = vmul.f32 %v268_v51, %v3195_v62 }
  0xbe   :  { %v216_v60 = vsel %vm213_vm5, %v215_v50, %v211_v58  ;;  %v230_v55 = vsel %vm229_vm6, %v1467_v59, %v226_v46  ;;  %v244_v42 = vsub.f32 1.0, %v243_v48  ;;  %v254_v44 = vor.u32 1.1754944e-38, %v253_v49  ;;  %v3196_v50 = vld [vmem:[#allocation29_spill] sm:$0xff]  ;;  %v3197_v48 = vld [vmem:[#allocation30_spill] sm:$0xff] }
  0xbf   :  { %v235_v63 = vsel %vm232_vm7, %v234_v56, %v230_v55  ;;  %v258_v41 = vmul.f32 %v1471_v57, %v216_v60  ;;  %v3194_v56 = vld [vmem:[#allocation27_spill] sm:$0xff]  ;;  %v271_v46 = vmul.f32 %v268_v51, %v3196_v50  ;;  %v274_v58 = vadd.f32 %v270_v53, %v3197_v48 }
  0xc0   :  { %v257_v40 = vmul.f32 0.0, %v235_v63  ;;  %v245_v39 = vmul.f32 %v1469_v54, %v244_v42  ;;  %v3192_v42 = vld [vmem:[#allocation25_spill] sm:$0xff]  ;;  %v3198_v57 = vld [vmem:[#allocation31_spill] sm:$0xff] }
  0xc1   :  { %v275_v60 = vadd.f32 %v271_v46, %v3198_v57 }
  0xc2   :  { %v2231_v61 = vadd.f32 %v258_v41, %v257_v40  ;;  %v246_v43 = vadd.f32 %v1469_v54, %v245_v39  ;;  %v3189_v39 = vld [vmem:[#allocation22_spill] sm:$0xff]  ;;  %v3190_v40 = vld [vmem:[#allocation23_spill] sm:$0xff]  ;;  %v3191_v41 = vld [vmem:[#allocation24_spill] sm:$0xff] }
  0xc4   :  { %1472 = vtanh.f32 %v2231_v61  ;;  %v250_v45 = vsel %vm249_vm10, %v1469_v54, %v246_v43  ;;  %v3193_v54 = vld [vmem:[#allocation26_spill] sm:$0xff] }
  0xc5   :  { %v255_v47 = vsel %vm252_vm11, %v254_v44, %v250_v45  ;;  %v273_v45 = vmul.f32 %v268_v51, %v3199_v52 }
  0xca   :  { %v1473_v59 = vpop.eup %1472 }
  0xcb   :  { %v261_v3 = vmul.f32 %v1473_v59, %v255_v47  ;;  %v1423_v47 = vld [vmem:[%s2995_s0 + $0x10] sm:$0xff] }
  0xcc   :  { %431 = vperm.xlu1 %1456, %v1423_v47  }
  0xcd   :  { %262 = vst [vmem:[%s2998_s4] sm:$0xff] %v261_v3  ;;  %294 = vmatmul.f32.vlgmr.msrb.gmra.mxu0 %v261_v3  ;;  %314 = vmatmul.f32.vlgmr.msrb.gmra.mxu1 %v261_v3 }
  0xce   :  { %334 = vmatmul.f32.vlgmr.msrb.gmra.mxu2 %v261_v3  ;;  %354 = vmatmul.f32.vlgmr.msrb.gmra.mxu3 %v261_v3  ;;  %v3200_v3 = vld [vmem:[#allocation33_spill] sm:$0xff] }
  0xcf   :  { %606 = vmatpush.msrb.mxu0 %v1680_v0  ;;  %626 = vmatpush.msrb.mxu1 %v1685_v1  ;;  %v3169_v0 = vld [vmem:[#allocation2_spill] sm:$0xff]  ;;  %v3170_v1 = vld [vmem:[#allocation3_spill] sm:$0xff]  ;;  %v277_v50 = vadd.f32 %v273_v45, %v3200_v3 }
  0xd0   :  { %646 = vmatpush.msrb.mxu2 %v1690_v2  ;;  %666 = vmatpush.msrb.mxu3 %v1699_v4  ;;  %v3171_v2 = vld [vmem:[#allocation4_spill] sm:$0xff]  ;;  %v3172_v4 = vld [vmem:[#allocation5_spill] sm:$0xff]  ;;  %v3202_v45 = vld [vmem:[#allocation35_spill] sm:$0xff] }
  0xd1   :  { %607 = vmatpush.msrb.mxu0 %v1704_v5  ;;  %627 = vmatpush.msrb.mxu1 %v1709_v6  ;;  %v3173_v5 = vld [vmem:[#allocation6_spill] sm:$0xff]  ;;  %v3174_v6 = vld [vmem:[#allocation7_spill] sm:$0xff] }
  0xd2   :  { %647 = vmatpush.msrb.mxu2 %v1716_v7  ;;  %667 = vmatpush.msrb.mxu3 %v1721_v8  ;;  %v3175_v7 = vld [vmem:[#allocation8_spill] sm:$0xff]  ;;  %v3176_v8 = vld [vmem:[#allocation9_spill] sm:$0xff] }
  0xd3   :  { %608 = vmatpush.msrb.mxu0 %v1726_v9  ;;  %628 = vmatpush.msrb.mxu1 %v1733_v10  ;;  %v3177_v9 = vld [vmem:[#allocation10_spill] sm:$0xff]  ;;  %v3178_v10 = vld [vmem:[#allocation11_spill] sm:$0xff] }
  0xd4   :  { %648 = vmatpush.msrb.mxu2 %v1738_v11  ;;  %668 = vmatpush.msrb.mxu3 %v1743_v12  ;;  %v3179_v11 = vld [vmem:[#allocation12_spill] sm:$0xff]  ;;  %v3180_v12 = vld [vmem:[#allocation13_spill] sm:$0xff] }
  0xd5   :  { %609 = vmatpush.msrb.mxu0 %v1750_v13  ;;  %629 = vmatpush.msrb.mxu1 %v1755_v14  ;;  %v3181_v13 = vld [vmem:[#allocation14_spill] sm:$0xff]  ;;  %v3182_v14 = vld [vmem:[#allocation15_spill] sm:$0xff] }
  0xd6   :  { %649 = vmatpush.msrb.mxu2 %v1762_v15  ;;  %669 = vmatpush.msrb.mxu3 %v1767_v16  ;;  %v3183_v15 = vld [vmem:[#allocation16_spill] sm:$0xff]  ;;  %v3184_v16 = vld [vmem:[#allocation17_spill] sm:$0xff] }
  0xd7   :  { %610 = vmatpush.msrb.mxu0 %v1774_v17  ;;  %630 = vmatpush.msrb.mxu1 %v1779_v18  ;;  %v3185_v17 = vld [vmem:[#allocation18_spill] sm:$0xff]  ;;  %v3186_v18 = vld [vmem:[#allocation19_spill] sm:$0xff] }
  0xd8   :  { %650 = vmatpush.msrb.mxu2 %v1786_v19  ;;  %670 = vmatpush.msrb.mxu3 %v1791_v20  ;;  %v3187_v19 = vld [vmem:[#allocation20_spill] sm:$0xff]  ;;  %v3188_v20 = vld [vmem:[#allocation21_spill] sm:$0xff] }
  0xd9   :  { %611 = vmatpush.msrb.mxu0 %v1798_v21  ;;  %631 = vmatpush.msrb.mxu1 %v1803_v22 }
  0xda   :  { %651 = vmatpush.msrb.mxu2 %v1810_v23  ;;  %671 = vmatpush.msrb.mxu3 %v1815_v24 }
  0xdb   :  { %612 = vmatpush.msrb.mxu0 %v1822_v25  ;;  %632 = vmatpush.msrb.mxu1 %v1827_v26 }
  0xdc   :  { %652 = vmatpush.msrb.mxu2 %v1834_v27  ;;  %672 = vmatpush.msrb.mxu3 %v1839_v28 }
  0xdd   :  { %613 = vmatpush.msrb.mxu0 %v1846_v29  ;;  %633 = vmatpush.msrb.mxu1 %v1851_v30 }
  0xde   :  { %653 = vmatpush.msrb.mxu2 %v1858_v31  ;;  %673 = vmatpush.msrb.mxu3 %v1863_v32 }
  0xdf   :  { %614 = vmatpush.msrb.mxu0 %v1870_v33  ;;  %634 = vmatpush.msrb.mxu1 %v1875_v34 }
  0xe0   :  { %654 = vmatpush.msrb.mxu2 %v1882_v35  ;;  %674 = vmatpush.msrb.mxu3 %v1887_v36 }
  0xe1   :  { %615 = vmatpush.msrb.mxu0 %v1894_v37  ;;  %635 = vmatpush.msrb.mxu1 %v1899_v38 }
  0xe2   :  { %655 = vmatpush.msrb.mxu2 %v3169_v0  ;;  %675 = vmatpush.msrb.mxu3 %v3170_v1 }
  0xe3   :  { %616 = vmatpush.msrb.mxu0 %v3171_v2  ;;  %636 = vmatpush.msrb.mxu1 %v3172_v4 }
  0xe4   :  { %656 = vmatpush.msrb.mxu2 %v3173_v5  ;;  %676 = vmatpush.msrb.mxu3 %v3174_v6 }
  0xe5   :  { %617 = vmatpush.msrb.mxu0 %v3175_v7  ;;  %637 = vmatpush.msrb.mxu1 %v3176_v8 }
  0xe6   :  { %657 = vmatpush.msrb.mxu2 %v3177_v9  ;;  %677 = vmatpush.msrb.mxu3 %v3178_v10 }
  0xe7   :  { %618 = vmatpush.msrb.mxu0 %v3179_v11  ;;  %638 = vmatpush.msrb.mxu1 %v3180_v12 }
  0xe8   :  { %658 = vmatpush.msrb.mxu2 %v3181_v13  ;;  %678 = vmatpush.msrb.mxu3 %v3182_v14 }
  0xe9   :  { %619 = vmatpush.msrb.mxu0 %v3183_v15  ;;  %639 = vmatpush.msrb.mxu1 %v3184_v16 }
  0xea   :  { %659 = vmatpush.msrb.mxu2 %v3185_v17  ;;  %679 = vmatpush.msrb.mxu3 %v3186_v18 }
  0xeb   :  { %620 = vmatpush.msrb.mxu0 %v3187_v19  ;;  %640 = vmatpush.msrb.mxu1 %v3188_v20 }
  0xec   :  { %660 = vmatpush.msrb.mxu2 %v3189_v39  ;;  %680 = vmatpush.msrb.mxu3 %v3190_v40 }
  0xed   :  { %621 = vmatpush.msrb.mxu0 %v3191_v41  ;;  %641 = vmatpush.msrb.mxu1 %v3192_v42 }
  0xee   :  { %661 = vmatpush.msrb.mxu2 %v3193_v54  ;;  %681 = vmatpush.msrb.mxu3 %v3194_v56 }
 0x14a   :  { %v295_v55 = vpop.f32.mrf.mxu0  ;;  %v315_v63 = vpop.f32.mrf.mxu1 }
 0x14b   :  { %v358_v43 = vadd.f32 %v295_v55, %v274_v58  ;;  %v359_v49 = vadd.f32 %v315_v63, %v275_v60  ;;  %v1428_v58 = vld [vmem:[%s2995_s0 + $0x18] sm:$0xff] }
 0x14c   :  { %595 = vperm.xlu1 %1456, %v1428_v58  }
 0x14d   :  { %v1419_v44 = vmul.f32 -1.442695, %v358_v43  ;;  %v1420_v59 = vmul.f32 -1.442695, %v359_v49  ;;  %v3201_v49 = vld [vmem:[#allocation34_spill] sm:$0xff] }
 0x14f   :  { %1474 = vpow2.f32 %v1419_v44  ;;  %v272_v44 = vmul.f32 %v268_v51, %v3201_v49 }
 0x150   :  { %1476 = vpow2.f32 %v1420_v59 }
 0x151   :  { %v355_v53 = vpop.f32.mrf.mxu3  ;;  %v335_v59 = vpop.f32.mrf.mxu2  ;;  %v276_v3 = vadd.f32 %v272_v44, %v3202_v45 }
 0x152   :  { %v361_v48 = vadd.f32 %v355_v53, %v277_v50  ;;  %v1448_v50 = vld [vmem:[%s2995_s0 + $0x38] sm:$0xff] }
 0x153   :  { %v360_v52 = vadd.f32 %v335_v59, %v276_v3 }
 0x154   :  { %v1421_v46 = vmul.f32 -1.442695, %v361_v48  ;;  %1251 = vperm.xlu1 %1456, %v1448_v50  }
 0x155   :  { %v1475_v60 = vpop.eup %1474 }
 0x156   :  { %v1477_v55 = vpop.eup %1476  ;;  %v365_v63 = vadd.f32 1.0, %v1475_v60  ;;  %1478 = vpow2.f32 %v1421_v46 }
 0x157   :  { %v384_v43 = vadd.f32 1.0, %v1477_v55 }
 0x158   :  { %1480 = vrcp.f32 %v365_v63  ;;  %v377_v51 = vand.u32 2147483648, %v365_v63  ;;  %v375_v44 = vand.u32 2147483647, %v365_v63  ;;  %vm371_vm14 = vweird.f32 %v365_v63 }
 0x159   :  { %1482 = vrcp.f32 %v384_v43  ;;  %v396_v49 = vand.u32 2147483648, %v384_v43  ;;  %v394_v56 = vand.u32 2147483647, %v384_v43  ;;  %vm390_vm15 = vweird.f32 %v384_v43 }
 0x15a   :  { %v378_v3 = vor.u32 1.1754944e-38, %v377_v51  ;;  %vm376_vm2 = vcmp.eq.f32.partialorder %v375_v44, 8.507059e+37 }
 0x15b   :  { %vm395_vm3 = vcmp.eq.f32.partialorder %v394_v56, 8.507059e+37 }
 0x15c   :  { %v1479_v47 = vpop.eup %1478 }
 0x15d   :  { %v404_v48 = vadd.f32 1.0, %v1479_v47 }
 0x15e   :  { %v1481_v53 = vpop.eup %1480 }
 0x15f   :  { %v1483_v57 = vpop.eup %1482  ;;  %v367_v60 = vmul.f32 %v1481_v53, %v365_v63  ;;  %1484 = vrcp.f32 %v404_v48  ;;  %vm372_vm12 = vweird.f32 %v1481_v53  ;;  %vm410_vm5 = vweird.f32 %v404_v48 }
 0x160   :  { %v386_v46 = vmul.f32 %v1483_v57, %v384_v43  ;;  %1486 = vtanh.f32 %v360_v52  ;;  %vm391_vm13 = vweird.f32 %v1483_v57  ;;  %vm373_vm0 = vmor %vm371_vm14, %vm372_vm12 }
 0x161   :  { %v368_v58 = vsub.f32 1.0, %v367_v60  ;;  %vm392_vm1 = vmor %vm390_vm15, %vm391_vm13  ;;  %v397_v60 = vor.u32 1.1754944e-38, %v396_v49  ;;  %v414_v49 = vand.u32 2147483647, %v404_v48 }
 0x162   :  { %v387_v55 = vsub.f32 1.0, %v386_v46 }
 0x163   :  { %v369_v62 = vmul.f32 %v1481_v53, %v368_v58  ;;  %vm415_vm7 = vcmp.eq.f32.partialorder %v414_v49, 8.507059e+37  ;;  %v2442_v49 = vld [vmem:[%s2994_s3 + $0x178] sm:$0xff] }
 0x164   :  { %v388_v45 = vmul.f32 %v1483_v57, %v387_v55 }
 0x165   :  { %v1485_v54 = vpop.eup %1484  ;;  %v370_v47 = vadd.f32 %v1481_v53, %v369_v62 }
 0x166   :  { %v389_v59 = vadd.f32 %v1483_v57, %v388_v45  ;;  %v406_v50 = vmul.f32 %v1485_v54, %v404_v48  ;;  %v1487_v52 = vpop.eup %1486  ;;  %vm411_vm4 = vweird.f32 %v1485_v54  ;;  %v416_v45 = vand.u32 2147483648, %v404_v48  ;;  %v2364_v48 = vld [vmem:[%s2994_s3 + $0x1d0] sm:$0xff] }
 0x167   :  { %v374_v46 = vsel %vm373_vm0, %v1481_v53, %v370_v47  ;;  %vm412_vm6 = vmor %vm410_vm5, %vm411_vm4  ;;  %v2370_v47 = vld [vmem:[%s2994_s3 + $0x1d8] sm:$0xff] }
 0x168   :  { %v379_v42 = vsel %vm376_vm2, %v378_v3, %v374_v46  ;;  %v393_v58 = vsel %vm392_vm1, %v1483_v57, %v389_v59  ;;  %v407_v41 = vsub.f32 1.0, %v406_v50  ;;  %v417_v51 = vor.u32 1.1754944e-38, %v416_v45  ;;  %v2376_v3 = vld [vmem:[%s2994_s3 + $0x1a0] sm:$0xff]  ;;  %v2382_v59 = vld [vmem:[%s2994_s3 + $0x1a8] sm:$0xff]  ;;  %v2388_v50 = vld [vmem:[%s2994_s3 + $0x1b0] sm:$0xff] }
 0x169   :  { %v398_v55 = vsel %vm395_vm3, %v397_v60, %v393_v58  ;;  %v421_v40 = vmul.f32 %v1487_v52, %v379_v42  ;;  %v2352_v42 = vld [vmem:[%s2994_s3 + $0x1c0] sm:$0xff]  ;;  %v2394_v60 = vld [vmem:[%s2994_s3 + $0x1b8] sm:$0xff]  ;;  %v2406_v52 = vld [vmem:[%s2994_s3 + $0x188] sm:$0xff] }
 0x16a   :  { %v420_v39 = vmul.f32 %v398_v55, %v2231_v61  ;;  %v408_v62 = vmul.f32 %v1485_v54, %v407_v41  ;;  %v2328_v61 = vld [vmem:[%s2994_s3 + $0x1e0] sm:$0xff]  ;;  %v2346_v41 = vld [vmem:[%s2994_s3 + $0x1f8] sm:$0xff]  ;;  %v2412_v58 = vld [vmem:[%s2994_s3 + $0x190] sm:$0xff] }
 0x16b   :  { %v2400_v46 = vld [vmem:[%s2994_s3 + $0x180] sm:$0xff]  ;;  %v2418_v55 = vld [vmem:[%s2994_s3 + $0x198] sm:$0xff]  ;;  %v2436_v45 = vld [vmem:[%s2994_s3 + $0x170] sm:$0xff] }
 0x16c   :  { %v2319_v63 = vadd.f32 %v421_v40, %v420_v39  ;;  %v409_v43 = vadd.f32 %v1485_v54, %v408_v62  ;;  %v2334_v39 = vld [vmem:[%s2994_s3 + $0x1e8] sm:$0xff]  ;;  %v2340_v40 = vld [vmem:[%s2994_s3 + $0x1f0] sm:$0xff]  ;;  %v2424_v62 = vld [vmem:[%s2994_s3 + $0x160] sm:$0xff] }
 0x16e   :  { %1488 = vtanh.f32 %v2319_v63  ;;  %v413_v53 = vsel %vm412_vm6, %v1485_v54, %v409_v43  ;;  %v2358_v54 = vld [vmem:[%s2994_s3 + $0x1c8] sm:$0xff] }
 0x16f   :  { %v418_v57 = vsel %vm415_vm7, %v417_v51, %v413_v53  ;;  %v2430_v43 = vld [vmem:[%s2994_s3 + $0x168] sm:$0xff] }
 0x174   :  { %v1489_v56 = vpop.eup %1488 }
 0x175   :  { %v424_v44 = vmul.f32 %v1489_v56, %v418_v57 }
 0x177   :  { %1422 = vst [vmem:[%s2998_s4 + $0x8] sm:$0xff] %v424_v44  ;;  %458 = vmatmul.f32.vlgmr.msra.gmra.mxu0 %v424_v44  ;;  %478 = vmatmul.f32.vlgmr.msra.gmra.mxu1 %v424_v44 }
 0x178   :  { %498 = vmatmul.f32.vlgmr.msra.gmra.mxu2 %v424_v44  ;;  %518 = vmatmul.f32.vlgmr.msra.gmra.mxu3 %v424_v44 }
 0x179   :  { %770 = vmatpush.msra.mxu0 %v2328_v61  ;;  %790 = vmatpush.msra.mxu1 %v2334_v39 }
 0x17a   :  { %810 = vmatpush.msra.mxu2 %v2340_v40  ;;  %830 = vmatpush.msra.mxu3 %v2346_v41 }
 0x17b   :  { %771 = vmatpush.msra.mxu0 %v2352_v42  ;;  %791 = vmatpush.msra.mxu1 %v2358_v54 }
 0x17c   :  { %811 = vmatpush.msra.mxu2 %v2364_v48  ;;  %831 = vmatpush.msra.mxu3 %v2370_v47 }
 0x17d   :  { %772 = vmatpush.msra.mxu0 %v2376_v3  ;;  %792 = vmatpush.msra.mxu1 %v2382_v59 }
 0x17e   :  { %812 = vmatpush.msra.mxu2 %v2388_v50  ;;  %832 = vmatpush.msra.mxu3 %v2394_v60 }
 0x17f   :  { %773 = vmatpush.msra.mxu0 %v2400_v46  ;;  %793 = vmatpush.msra.mxu1 %v2406_v52 }
 0x180   :  { %813 = vmatpush.msra.mxu2 %v2412_v58  ;;  %833 = vmatpush.msra.mxu3 %v2418_v55 }
 0x181   :  { %774 = vmatpush.msra.mxu0 %v2424_v62  ;;  %794 = vmatpush.msra.mxu1 %v2430_v43 }
 0x182   :  { %814 = vmatpush.msra.mxu2 %v2436_v45  ;;  %834 = vmatpush.msra.mxu3 %v2442_v49 }
 0x183   :  { %775 = vmatpush.msra.mxu0 %v1798_v21  ;;  %795 = vmatpush.msra.mxu1 %v1803_v22  ;;  %v3203_v21 = vld [vmem:[#allocation22_spill] sm:$0xff]  ;;  %v3204_v22 = vld [vmem:[#allocation23_spill] sm:$0xff] }
 0x184   :  { %815 = vmatpush.msra.mxu2 %v1810_v23  ;;  %835 = vmatpush.msra.mxu3 %v1815_v24  ;;  %v3205_v23 = vld [vmem:[#allocation24_spill] sm:$0xff]  ;;  %v3206_v24 = vld [vmem:[#allocation25_spill] sm:$0xff] }
 0x185   :  { %776 = vmatpush.msra.mxu0 %v1822_v25  ;;  %796 = vmatpush.msra.mxu1 %v1827_v26  ;;  %v3207_v25 = vld [vmem:[#allocation26_spill] sm:$0xff]  ;;  %v3208_v26 = vld [vmem:[#allocation27_spill] sm:$0xff] }
 0x186   :  { %816 = vmatpush.msra.mxu2 %v1834_v27  ;;  %836 = vmatpush.msra.mxu3 %v1839_v28  ;;  %v432_v27 = vpop.permute.xlu1 %431  ;;  %v3209_v28 = vld [vmem:[#allocation28_spill] sm:$0xff] }
 0x187   :  { %777 = vmatpush.msra.mxu0 %v1846_v29  ;;  %797 = vmatpush.msra.mxu1 %v1851_v30  ;;  %v434_v29 = vmul.f32 %v432_v27, %v3209_v28  ;;  %v3210_v30 = vld [vmem:[#allocation29_spill] sm:$0xff] }
 0x188   :  { %817 = vmatpush.msra.mxu2 %v1858_v31  ;;  %837 = vmatpush.msra.mxu3 %v1863_v32  ;;  %v435_v31 = vmul.f32 %v432_v27, %v3210_v30  ;;  %v3211_v32 = vld [vmem:[#allocation30_spill] sm:$0xff] }
 0x189   :  { %778 = vmatpush.msra.mxu0 %v1870_v33  ;;  %798 = vmatpush.msra.mxu1 %v1875_v34  ;;  %v438_v33 = vadd.f32 %v434_v29, %v3211_v32  ;;  %v3212_v34 = vld [vmem:[#allocation31_spill] sm:$0xff] }
 0x18a   :  { %818 = vmatpush.msra.mxu2 %v1882_v35  ;;  %838 = vmatpush.msra.mxu3 %v1887_v36  ;;  %v439_v35 = vadd.f32 %v435_v31, %v3212_v34 }
 0x18b   :  { %779 = vmatpush.msra.mxu0 %v1894_v37  ;;  %799 = vmatpush.msra.mxu1 %v1899_v38 }
 0x18c   :  { %819 = vmatpush.msra.mxu2 %v3169_v0  ;;  %839 = vmatpush.msra.mxu3 %v3170_v1  ;;  %v3213_v1 = vld [vmem:[#allocation32_spill] sm:$0xff] }
 0x18d   :  { %780 = vmatpush.msra.mxu0 %v3171_v2  ;;  %800 = vmatpush.msra.mxu1 %v3172_v4  ;;  %v437_v2 = vmul.f32 %v432_v27, %v3213_v1 }
 0x18e   :  { %820 = vmatpush.msra.mxu2 %v3173_v5  ;;  %840 = vmatpush.msra.mxu3 %v3174_v6  ;;  %v3214_v6 = vld [vmem:[#allocation33_spill] sm:$0xff] }
 0x18f   :  { %781 = vmatpush.msra.mxu0 %v3175_v7  ;;  %801 = vmatpush.msra.mxu1 %v3176_v8  ;;  %v441_v7 = vadd.f32 %v437_v2, %v3214_v6 }
 0x190   :  { %821 = vmatpush.msra.mxu2 %v3177_v9  ;;  %841 = vmatpush.msra.mxu3 %v3178_v10 }
 0x191   :  { %782 = vmatpush.msra.mxu0 %v3179_v11  ;;  %802 = vmatpush.msra.mxu1 %v3180_v12 }
 0x192   :  { %822 = vmatpush.msra.mxu2 %v3181_v13  ;;  %842 = vmatpush.msra.mxu3 %v3182_v14 }
 0x193   :  { %783 = vmatpush.msra.mxu0 %v3183_v15  ;;  %803 = vmatpush.msra.mxu1 %v3184_v16  ;;  %v3215_v15 = vld [vmem:[#allocation34_spill] sm:$0xff] }
 0x194   :  { %823 = vmatpush.msra.mxu2 %v3185_v17  ;;  %843 = vmatpush.msra.mxu3 %v3186_v18  ;;  %v436_v16 = vmul.f32 %v432_v27, %v3215_v15 }
 0x195   :  { %784 = vmatpush.msra.mxu0 %v3187_v19  ;;  %804 = vmatpush.msra.mxu1 %v3188_v20  ;;  %v3216_v19 = vld [vmem:[#allocation35_spill] sm:$0xff] }
 0x196   :  { %824 = vmatpush.msra.mxu2 %v3203_v21  ;;  %844 = vmatpush.msra.mxu3 %v3204_v22  ;;  %v440_v20 = vadd.f32 %v436_v16, %v3216_v19 }
 0x197   :  { %785 = vmatpush.msra.mxu0 %v3205_v23  ;;  %805 = vmatpush.msra.mxu1 %v3206_v24 }
 0x198   :  { %825 = vmatpush.msra.mxu2 %v3207_v25  ;;  %845 = vmatpush.msra.mxu3 %v3208_v26 }
 0x1f4   :  { %v459_v36 = vpop.f32.mrf.mxu0  ;;  %v479_v37 = vpop.f32.mrf.mxu1 }
 0x1f5   :  { %v522_v38 = vadd.f32 %v459_v36, %v438_v33  ;;  %v523_v0 = vadd.f32 %v479_v37, %v439_v35 }
 0x1f7   :  { %v1424_v4 = vmul.f32 -1.442695, %v522_v38  ;;  %v1425_v5 = vmul.f32 -1.442695, %v523_v0 }
 0x1f9   :  { %1490 = vpow2.f32 %v1424_v4 }
 0x1fa   :  { %1492 = vpow2.f32 %v1425_v5 }
 0x1fb   :  { %v519_v8 = vpop.f32.mrf.mxu3  ;;  %v499_v17 = vpop.f32.mrf.mxu2 }
 0x1fc   :  { %v525_v9 = vadd.f32 %v519_v8, %v441_v7  ;;  %v524_v56 = vadd.f32 %v499_v17, %v440_v20 }
 0x1fe   :  { %v1426_v10 = vmul.f32 -1.442695, %v525_v9 }
 0x1ff   :  { %v1491_v11 = vpop.eup %1490 }
 0x200   :  { %v1493_v12 = vpop.eup %1492  ;;  %v529_v13 = vadd.f32 1.0, %v1491_v11  ;;  %1494 = vpow2.f32 %v1426_v10 }
 0x201   :  { %v548_v14 = vadd.f32 1.0, %v1493_v12 }
 0x202   :  { %1496 = vrcp.f32 %v529_v13  ;;  %v541_v24 = vand.u32 2147483648, %v529_v13  ;;  %v539_v27 = vand.u32 2147483647, %v529_v13  ;;  %vm535_vm10 = vweird.f32 %v529_v13 }
 0x203   :  { %1498 = vrcp.f32 %v548_v14  ;;  %v560_v25 = vand.u32 2147483648, %v548_v14  ;;  %v558_v31 = vand.u32 2147483647, %v548_v14  ;;  %vm554_vm11 = vweird.f32 %v548_v14 }
 0x204   :  { %v542_v36 = vor.u32 1.1754944e-38, %v541_v24  ;;  %vm540_vm14 = vcmp.eq.f32.partialorder %v539_v27, 8.507059e+37  ;;  %v2563_v24 = vld [vmem:[%s2994_s3 + $0x130] sm:$0xff]  ;;  %v2581_v27 = vld [vmem:[%s2994_s3 + $0x108] sm:$0xff] }
 0x205   :  { %v561_v0 = vor.u32 1.1754944e-38, %v560_v25  ;;  %vm559_vm15 = vcmp.eq.f32.partialorder %v558_v31, 8.507059e+37  ;;  %v2569_v25 = vld [vmem:[%s2994_s3 + $0x138] sm:$0xff] }
 0x206   :  { %v1495_v18 = vpop.eup %1494  ;;  %v2593_v31 = vld [vmem:[%s2994_s3 + $0x118] sm:$0xff] }
 0x207   :  { %v568_v53 = vadd.f32 1.0, %v1495_v18 }
 0x208   :  { %v1497_v51 = vpop.eup %1496 }
 0x209   :  { %v1499_v57 = vpop.eup %1498  ;;  %v531_v44 = vmul.f32 %v1497_v51, %v529_v13  ;;  %1500 = vrcp.f32 %v568_v53  ;;  %vm536_vm8 = vweird.f32 %v1497_v51  ;;  %v580_v16 = vand.u32 2147483648, %v568_v53 }
 0x20a   :  { %v550_v21 = vmul.f32 %v1499_v57, %v548_v14  ;;  %1502 = vtanh.f32 %v524_v56  ;;  %vm555_vm9 = vweird.f32 %v1499_v57  ;;  %vm537_vm12 = vmor %vm535_vm10, %vm536_vm8  ;;  %vm574_vm1 = vweird.f32 %v568_v53 }
 0x20b   :  { %v532_v22 = vsub.f32 1.0, %v531_v44  ;;  %vm556_vm13 = vmor %vm554_vm11, %vm555_vm9  ;;  %v578_v17 = vand.u32 2147483647, %v568_v53  ;;  %v581_v20 = vor.u32 1.1754944e-38, %v580_v16  ;;  %v2539_v44 = vld [vmem:[%s2994_s3 + $0x150] sm:$0xff]  ;;  %v2695_v16 = vld [vmem:[%s2994_s3 + $0x60] sm:$0xff] }
 0x20c   :  { %v551_v23 = vsub.f32 1.0, %v550_v21  ;;  %v2545_v21 = vld [vmem:[%s2994_s3 + $0x158] sm:$0xff]  ;;  %3227 = vst [vmem:[#allocation12_spill] sm:$0xff] %v2695_v16 }
 0x20d   :  { %v533_v26 = vmul.f32 %v1497_v51, %v532_v22  ;;  %vm579_vm3 = vcmp.eq.f32.partialorder %v578_v17, 8.507059e+37  ;;  %v2551_v22 = vld [vmem:[%s2994_s3 + $0x120] sm:$0xff]  ;;  %v2701_v17 = vld [vmem:[%s2994_s3 + $0x68] sm:$0xff] }
 0x20e   :  { %v552_v29 = vmul.f32 %v1499_v57, %v551_v23  ;;  %v2557_v23 = vld [vmem:[%s2994_s3 + $0x128] sm:$0xff]  ;;  %3228 = vst [vmem:[#allocation13_spill] sm:$0xff] %v2701_v17 }
 0x20f   :  { %v1501_v33 = vpop.eup %1500  ;;  %v534_v35 = vadd.f32 %v1497_v51, %v533_v26  ;;  %v2575_v26 = vld [vmem:[%s2994_s3 + $0x100] sm:$0xff] }
 0x210   :  { %v553_v37 = vadd.f32 %v1499_v57, %v552_v29  ;;  %v570_v38 = vmul.f32 %v1501_v33, %v568_v53  ;;  %v1503_v4 = vpop.eup %1502  ;;  %vm575_vm0 = vweird.f32 %v1501_v33  ;;  %v2533_v53 = vld [vmem:[%s2994_s3 + $0x148] sm:$0xff]  ;;  %v2587_v29 = vld [vmem:[%s2994_s3 + $0x110] sm:$0xff] }
 0x211   :  { %v538_v2 = vsel %vm537_vm12, %v1497_v51, %v534_v35  ;;  %vm576_vm2 = vmor %vm574_vm1, %vm575_vm0  ;;  %v2605_v35 = vld [vmem:[%s2994_s3 + $0xe8] sm:$0xff] }
 0x212   :  { %v543_v5 = vsel %vm540_vm14, %v542_v36, %v538_v2  ;;  %v557_v7 = vsel %vm556_vm13, %v1499_v57, %v553_v37  ;;  %v571_v8 = vsub.f32 1.0, %v570_v38  ;;  %v2611_v36 = vld [vmem:[%s2994_s3 + $0xf0] sm:$0xff]  ;;  %v2617_v37 = vld [vmem:[%s2994_s3 + $0xf8] sm:$0xff]  ;;  %v2623_v38 = vld [vmem:[%s2994_s3 + $0xc0] sm:$0xff] }
 0x213   :  { %v562_v9 = vsel %vm559_vm15, %v561_v0, %v557_v7  ;;  %v585_v10 = vmul.f32 %v1503_v4, %v543_v5  ;;  %v2629_v0 = vld [vmem:[%s2994_s3 + $0xc8] sm:$0xff]  ;;  %v2635_v2 = vld [vmem:[%s2994_s3 + $0xd0] sm:$0xff]  ;;  %v2641_v4 = vld [vmem:[%s2994_s3 + $0xd8] sm:$0xff] }
 0x214   :  { %v584_v11 = vmul.f32 %v562_v9, %v2319_v63  ;;  %v572_v12 = vmul.f32 %v1501_v33, %v571_v8  ;;  %v2527_v63 = vld [vmem:[%s2994_s3 + $0x140] sm:$0xff]  ;;  %3217 = vst [vmem:[#allocation2_spill] sm:$0xff] %v2635_v2  ;;  %v2653_v7 = vld [vmem:[%s2994_s3 + $0xa8] sm:$0xff]  ;;  %v2659_v8 = vld [vmem:[%s2994_s3 + $0xb0] sm:$0xff] }
 0x215   :  { %3218 = vst [vmem:[#allocation3_spill] sm:$0xff] %v2641_v4  ;;  %v2647_v5 = vld [vmem:[%s2994_s3 + $0xa0] sm:$0xff]  ;;  %v2665_v9 = vld [vmem:[%s2994_s3 + $0xb8] sm:$0xff] }
 0x216   :  { %v2498_v13 = vadd.f32 %v585_v10, %v584_v11  ;;  %v573_v14 = vadd.f32 %v1501_v33, %v572_v12  ;;  %3219 = vst [vmem:[#allocation4_spill] sm:$0xff] %v2647_v5  ;;  %v2671_v10 = vld [vmem:[%s2994_s3 + $0x80] sm:$0xff]  ;;  %v2677_v11 = vld [vmem:[%s2994_s3 + $0x88] sm:$0xff]  ;;  %v2683_v12 = vld [vmem:[%s2994_s3 + $0x90] sm:$0xff] }
 0x217   :  { %3220 = vst [vmem:[#allocation5_spill] sm:$0xff] %v2653_v7 }
 0x218   :  { %1504 = vtanh.f32 %v2498_v13  ;;  %v577_v18 = vsel %vm576_vm2, %v1501_v33, %v573_v14  ;;  %v2599_v33 = vld [vmem:[%s2994_s3 + $0xe0] sm:$0xff]  ;;  %3221 = vst [vmem:[#allocation6_spill] sm:$0xff] %v2659_v8  ;;  %v2689_v14 = vld [vmem:[%s2994_s3 + $0x98] sm:$0xff] }
 0x219   :  { %v582_v56 = vsel %vm579_vm3, %v581_v20, %v577_v18  ;;  %3222 = vst [vmem:[#allocation7_spill] sm:$0xff] %v2665_v9  ;;  %v2707_v18 = vld [vmem:[%s2994_s3 + $0x70] sm:$0xff]  ;;  %v2713_v20 = vld [vmem:[%s2994_s3 + $0x78] sm:$0xff] }
 0x21a   :  { %3223 = vst [vmem:[#allocation8_spill] sm:$0xff] %v2671_v10 }
 0x21b   :  { %3224 = vst [vmem:[#allocation9_spill] sm:$0xff] %v2677_v11 }
 0x21c   :  { %3225 = vst [vmem:[#allocation10_spill] sm:$0xff] %v2683_v12 }
 0x21d   :  { %3226 = vst [vmem:[#allocation11_spill] sm:$0xff] %v2689_v14 }
 0x21e   :  { %v1505_v51 = vpop.eup %1504  ;;  %3229 = vst [vmem:[#allocation14_spill] sm:$0xff] %v2707_v18 }
 0x21f   :  { %v588_v57 = vmul.f32 %v1505_v51, %v582_v56  ;;  %3230 = vst [vmem:[#allocation15_spill] sm:$0xff] %v2713_v20  ;;  %v2719_v51 = vld [vmem:[%s2994_s3 + $0x40] sm:$0xff]  ;;  %v2725_v56 = vld [vmem:[%s2994_s3 + $0x48] sm:$0xff] }
 0x220   :  { %3231 = vst [vmem:[#allocation16_spill] sm:$0xff] %v2719_v51 }
 0x221   :  { %1427 = vst [vmem:[%s2998_s4 + $0x10] sm:$0xff] %v588_v57  ;;  %622 = vmatmul.f32.vlgmr.msrb.gmra.mxu0 %v588_v57  ;;  %642 = vmatmul.f32.vlgmr.msrb.gmra.mxu1 %v588_v57 }
 0x222   :  { %662 = vmatmul.f32.vlgmr.msrb.gmra.mxu2 %v588_v57  ;;  %682 = vmatmul.f32.vlgmr.msrb.gmra.mxu3 %v588_v57  ;;  %3232 = vst [vmem:[#allocation17_spill] sm:$0xff] %v2725_v56  ;;  %v2731_v57 = vld [vmem:[%s2994_s3 + $0x50] sm:$0xff] }
 0x223   :  { %934 = vmatpush.msrb.mxu0 %v2328_v61  ;;  %954 = vmatpush.msrb.mxu1 %v2334_v39  ;;  %3233 = vst [vmem:[#allocation18_spill] sm:$0xff] %v2731_v57 }
 0x224   :  { %974 = vmatpush.msrb.mxu2 %v2340_v40  ;;  %994 = vmatpush.msrb.mxu3 %v2346_v41 }
 0x225   :  { %935 = vmatpush.msrb.mxu0 %v2352_v42  ;;  %955 = vmatpush.msrb.mxu1 %v2358_v54 }
 0x226   :  { %975 = vmatpush.msrb.mxu2 %v2364_v48  ;;  %995 = vmatpush.msrb.mxu3 %v2370_v47 }
 0x227   :  { %936 = vmatpush.msrb.mxu0 %v2376_v3  ;;  %956 = vmatpush.msrb.mxu1 %v2382_v59 }
 0x228   :  { %976 = vmatpush.msrb.mxu2 %v2388_v50  ;;  %996 = vmatpush.msrb.mxu3 %v2394_v60 }
 0x229   :  { %937 = vmatpush.msrb.mxu0 %v2400_v46  ;;  %957 = vmatpush.msrb.mxu1 %v2406_v52 }
 0x22a   :  { %977 = vmatpush.msrb.mxu2 %v2412_v58  ;;  %997 = vmatpush.msrb.mxu3 %v2418_v55 }
 0x22b   :  { %938 = vmatpush.msrb.mxu0 %v2424_v62  ;;  %958 = vmatpush.msrb.mxu1 %v2430_v43 }
 0x22c   :  { %978 = vmatpush.msrb.mxu2 %v2436_v45  ;;  %998 = vmatpush.msrb.mxu3 %v2442_v49 }
 0x22d   :  { %939 = vmatpush.msrb.mxu0 %v2527_v63  ;;  %959 = vmatpush.msrb.mxu1 %v2533_v53 }
 0x22e   :  { %979 = vmatpush.msrb.mxu2 %v2539_v44  ;;  %999 = vmatpush.msrb.mxu3 %v2545_v21 }
 0x22f   :  { %940 = vmatpush.msrb.mxu0 %v2551_v22  ;;  %960 = vmatpush.msrb.mxu1 %v2557_v23 }
 0x230   :  { %980 = vmatpush.msrb.mxu2 %v2563_v24  ;;  %1000 = vmatpush.msrb.mxu3 %v2569_v25 }
 0x231   :  { %941 = vmatpush.msrb.mxu0 %v2575_v26  ;;  %961 = vmatpush.msrb.mxu1 %v2581_v27 }
 0x232   :  { %981 = vmatpush.msrb.mxu2 %v2587_v29  ;;  %1001 = vmatpush.msrb.mxu3 %v2593_v31 }
 0x233   :  { %942 = vmatpush.msrb.mxu0 %v2599_v33  ;;  %962 = vmatpush.msrb.mxu1 %v2605_v35 }
 0x234   :  { %982 = vmatpush.msrb.mxu2 %v2611_v36  ;;  %1002 = vmatpush.msrb.mxu3 %v2617_v37 }
 0x235   :  { %943 = vmatpush.msrb.mxu0 %v2623_v38  ;;  %963 = vmatpush.msrb.mxu1 %v2629_v0 }
 0x236   :  { %983 = vmatpush.msrb.mxu2 %v2635_v2  ;;  %1003 = vmatpush.msrb.mxu3 %v2641_v4 }
 0x237   :  { %944 = vmatpush.msrb.mxu0 %v2647_v5  ;;  %964 = vmatpush.msrb.mxu1 %v2653_v7 }
 0x238   :  { %984 = vmatpush.msrb.mxu2 %v2659_v8  ;;  %1004 = vmatpush.msrb.mxu3 %v2665_v9 }
 0x239   :  { %945 = vmatpush.msrb.mxu0 %v2671_v10  ;;  %965 = vmatpush.msrb.mxu1 %v2677_v11 }
 0x23a   :  { %985 = vmatpush.msrb.mxu2 %v2683_v12  ;;  %1005 = vmatpush.msrb.mxu3 %v2689_v14 }
 0x23b   :  { %946 = vmatpush.msrb.mxu0 %v2695_v16  ;;  %966 = vmatpush.msrb.mxu1 %v2701_v17 }
 0x23c   :  { %986 = vmatpush.msrb.mxu2 %v2707_v18  ;;  %1006 = vmatpush.msrb.mxu3 %v2713_v20  ;;  %v2737_v20 = vld [vmem:[%s2994_s3 + $0x58] sm:$0xff] }
 0x23d   :  { %947 = vmatpush.msrb.mxu0 %v2719_v51  ;;  %967 = vmatpush.msrb.mxu1 %v2725_v56  ;;  %3234 = vst [vmem:[#allocation19_spill] sm:$0xff] %v2737_v20  ;;  %v2743_v51 = vld [vmem:[%s2994_s3 + $0x20] sm:$0xff]  ;;  %v2749_v56 = vld [vmem:[%s2994_s3 + $0x28] sm:$0xff] }
 0x23e   :  { %987 = vmatpush.msrb.mxu2 %v2731_v57  ;;  %1007 = vmatpush.msrb.mxu3 %v2737_v20  ;;  %3235 = vst [vmem:[#allocation20_spill] sm:$0xff] %v2743_v51  ;;  %v2755_v57 = vld [vmem:[%s2994_s3 + $0x30] sm:$0xff]  ;;  %v2761_v20 = vld [vmem:[%s2994_s3 + $0x38] sm:$0xff] }
 0x23f   :  { %948 = vmatpush.msrb.mxu0 %v2743_v51  ;;  %3236 = vst [vmem:[#allocation21_spill] sm:$0xff] %v2749_v56  ;;  %968 = vmatpush.msrb.mxu1 %v2749_v56  ;;  %v2767_v51 = vld [vmem:[%s2994_s3] sm:$0xff]  ;;  %v2773_v56 = vld [vmem:[%s2994_s3 + $0x8] sm:$0xff] }
 0x240   :  { %3237 = vst [vmem:[#allocation22_spill] sm:$0xff] %v2755_v57  ;;  %988 = vmatpush.msrb.mxu2 %v2755_v57  ;;  %1008 = vmatpush.msrb.mxu3 %v2761_v20  ;;  %v2779_v57 = vld [vmem:[%s2994_s3 + $0x10] sm:$0xff] }
 0x241   :  { %3238 = vst [vmem:[#allocation23_spill] sm:$0xff] %v2761_v20  ;;  %949 = vmatpush.msrb.mxu0 %v2767_v51  ;;  %969 = vmatpush.msrb.mxu1 %v2773_v56  ;;  %v2785_v20 = vld [vmem:[%s2994_s3 + $0x18] sm:$0xff] }
 0x242   :  { %3239 = vst [vmem:[#allocation24_spill] sm:$0xff] %v2767_v51  ;;  %989 = vmatpush.msrb.mxu2 %v2779_v57  ;;  %1009 = vmatpush.msrb.mxu3 %v2785_v20  ;;  %v596_v51 = vpop.permute.xlu1 %595 }
 0x243   :  { %3240 = vst [vmem:[#allocation25_spill] sm:$0xff] %v2773_v56  ;;  %v598_v18 = vmul.f32 %v596_v51, %v3209_v28  ;;  %v599_v17 = vmul.f32 %v596_v51, %v3210_v30  ;;  %v601_v10 = vmul.f32 %v596_v51, %v3213_v1 }
 0x244   :  { %3241 = vst [vmem:[#allocation26_spill] sm:$0xff] %v2779_v57 }
 0x245   :  { %3242 = vst [vmem:[#allocation27_spill] sm:$0xff] %v2785_v20  ;;  %v602_v56 = vadd.f32 %v598_v18, %v3211_v32  ;;  %v603_v16 = vadd.f32 %v599_v17, %v3212_v34  ;;  %v605_v20 = vadd.f32 %v601_v10, %v3214_v6 }
 0x29e   :  { %v623_v14 = vpop.f32.mrf.mxu0  ;;  %v643_v12 = vpop.f32.mrf.mxu1 }
 0x29f   :  { %v686_v11 = vadd.f32 %v623_v14, %v602_v56  ;;  %v687_v57 = vadd.f32 %v643_v12, %v603_v16  ;;  %v600_v14 = vmul.f32 %v596_v51, %v3215_v15 }
 0x2a1   :  { %v1429_v9 = vmul.f32 -1.442695, %v686_v11  ;;  %v1430_v8 = vmul.f32 -1.442695, %v687_v57  ;;  %v1433_v11 = vld [vmem:[%s2995_s0 + $0x20] sm:$0xff]  ;;  %v604_v10 = vadd.f32 %v600_v14, %v3216_v19 }
 0x2a2   :  { %759 = vperm.xlu2 %1457, %v1433_v11  }
 0x2a3   :  { %1506 = vpow2.f32 %v1429_v9 }
 0x2a4   :  { %1508 = vpow2.f32 %v1430_v8 }
 0x2a5   :  { %v683_v7 = vpop.f32.mrf.mxu3  ;;  %v663_v8 = vpop.f32.mrf.mxu2 }
 0x2a6   :  { %v689_v28 = vadd.f32 %v683_v7, %v605_v20  ;;  %v688_v12 = vadd.f32 %v663_v8, %v604_v10 }
 0x2a8   :  { %v1431_v5 = vmul.f32 -1.442695, %v689_v28 }
 0x2a9   :  { %v1507_v30 = vpop.eup %1506 }
 0x2aa   :  { %v1509_v4 = vpop.eup %1508  ;;  %v693_v18 = vadd.f32 1.0, %v1507_v30  ;;  %1510 = vpow2.f32 %v1431_v5  ;;  %v1438_v30 = vld [vmem:[%s2995_s0 + $0x28] sm:$0xff] }
 0x2ab   :  { %v712_v17 = vadd.f32 1.0, %v1509_v4  ;;  %923 = vperm.xlu2 %1457, %v1438_v30  }
 0x2ac   :  { %1512 = vrcp.f32 %v693_v18  ;;  %v705_v56 = vand.u32 2147483648, %v693_v18  ;;  %v703_v14 = vand.u32 2147483647, %v693_v18  ;;  %vm699_vm6 = vweird.f32 %v693_v18 }
 0x2ad   :  { %1514 = vrcp.f32 %v712_v17  ;;  %v724_v57 = vand.u32 2147483648, %v712_v17  ;;  %v722_v8 = vand.u32 2147483647, %v712_v17  ;;  %vm718_vm7 = vweird.f32 %v712_v17 }
 0x2ae   :  { %v706_v15 = vor.u32 1.1754944e-38, %v705_v56  ;;  %vm704_vm10 = vcmp.eq.f32.partialorder %v703_v14, 8.507059e+37  ;;  %v3249_v14 = vld [vmem:[#allocation8_spill] sm:$0xff] }
 0x2af   :  { %v725_v30 = vor.u32 1.1754944e-38, %v724_v57  ;;  %vm723_vm11 = vcmp.eq.f32.partialorder %v722_v8, 8.507059e+37  ;;  %v3248_v57 = vld [vmem:[#allocation7_spill] sm:$0xff]  ;;  %v3251_v8 = vld [vmem:[#allocation10_spill] sm:$0xff] }
 0x2b0   :  { %v1511_v9 = vpop.eup %1510 }
 0x2b1   :  { %v732_v7 = vadd.f32 1.0, %v1511_v9 }
 0x2b2   :  { %v1513_v28 = vpop.eup %1512 }
 0x2b3   :  { %v1515_v4 = vpop.eup %1514  ;;  %v695_v5 = vmul.f32 %v1513_v28, %v693_v18  ;;  %1516 = vrcp.f32 %v732_v7  ;;  %vm700_vm4 = vweird.f32 %v1513_v28  ;;  %v744_v56 = vand.u32 2147483648, %v732_v7 }
 0x2b4   :  { %v714_v16 = vmul.f32 %v1515_v4, %v712_v17  ;;  %1518 = vtanh.f32 %v688_v12  ;;  %vm719_vm5 = vweird.f32 %v1515_v4  ;;  %vm701_vm8 = vmor %vm699_vm6, %vm700_vm4  ;;  %vm738_vm13 = vweird.f32 %v732_v7 }
 0x2b5   :  { %v696_v20 = vsub.f32 1.0, %v695_v5  ;;  %vm720_vm9 = vmor %vm718_vm7, %vm719_vm5 }
 0x2b6   :  { %v715_v51 = vsub.f32 1.0, %v714_v16 }
 0x2b7   :  { %v697_v11 = vmul.f32 %v1513_v28, %v696_v20 }
 0x2b8   :  { %v716_v9 = vmul.f32 %v1515_v4, %v715_v51 }
 0x2b9   :  { %v1517_v10 = vpop.eup %1516  ;;  %v698_v19 = vadd.f32 %v1513_v28, %v697_v11 }
 0x2ba   :  { %v717_v6 = vadd.f32 %v1515_v4, %v716_v9  ;;  %v734_v1 = vmul.f32 %v1517_v10, %v732_v7  ;;  %v1519_v12 = vpop.eup %1518  ;;  %vm739_vm12 = vweird.f32 %v1517_v10  ;;  %v3250_v9 = vld [vmem:[#allocation9_spill] sm:$0xff] }
 0x2bb   :  { %v702_v5 = vsel %vm701_vm8, %v1513_v28, %v698_v19  ;;  %v742_v19 = vand.u32 2147483647, %v732_v7  ;;  %vm740_vm14 = vmor %vm738_vm13, %vm739_vm12  ;;  %v3247_v7 = vld [vmem:[#allocation6_spill] sm:$0xff] }
 0x2bc   :  { %v707_v16 = vsel %vm704_vm10, %v706_v15, %v702_v5  ;;  %v721_v20 = vsel %vm720_vm9, %v1515_v4, %v717_v6  ;;  %v735_v34 = vsub.f32 1.0, %v734_v1  ;;  %v745_v15 = vor.u32 1.1754944e-38, %v744_v56  ;;  %v3254_v5 = vld [vmem:[#allocation13_spill] sm:$0xff]  ;;  %v3261_v56 = vld [vmem:[#allocation20_spill] sm:$0xff] }
 0x2bd   :  { %v726_v51 = vsel %vm723_vm11, %v725_v30, %v721_v20  ;;  %v749_v32 = vmul.f32 %v1519_v12, %v707_v16  ;;  %vm743_vm15 = vcmp.eq.f32.partialorder %v742_v19, 8.507059e+37  ;;  %v3253_v30 = vld [vmem:[#allocation12_spill] sm:$0xff]  ;;  %v3255_v12 = vld [vmem:[#allocation14_spill] sm:$0xff]  ;;  %v3256_v16 = vld [vmem:[#allocation15_spill] sm:$0xff] }
 0x2be   :  { %v748_v2 = vmul.f32 %v726_v51, %v2498_v13  ;;  %v736_v11 = vmul.f32 %v1517_v10, %v735_v34  ;;  %v3244_v34 = vld [vmem:[#allocation3_spill] sm:$0xff]  ;;  %v3245_v13 = vld [vmem:[#allocation4_spill] sm:$0xff]  ;;  %v3258_v51 = vld [vmem:[#allocation17_spill] sm:$0xff] }
 0x2bf   :  { %v3257_v20 = vld [vmem:[#allocation16_spill] sm:$0xff]  ;;  %v3262_v19 = vld [vmem:[#allocation21_spill] sm:$0xff] }
 0x2c0   :  { %v2803_v18 = vadd.f32 %v749_v32, %v748_v2  ;;  %v737_v17 = vadd.f32 %v1517_v10, %v736_v11  ;;  %v3243_v32 = vld [vmem:[#allocation2_spill] sm:$0xff]  ;;  %v3246_v2 = vld [vmem:[#allocation5_spill] sm:$0xff] }
 0x2c1   :  { %v3259_v11 = vld [vmem:[#allocation18_spill] sm:$0xff] }
 0x2c2   :  { %1520 = vtanh.f32 %v2803_v18  ;;  %v741_v28 = vsel %vm740_vm14, %v1517_v10, %v737_v17  ;;  %v3252_v10 = vld [vmem:[#allocation11_spill] sm:$0xff] }
 0x2c3   :  { %v746_v1 = vsel %vm743_vm15, %v745_v15, %v741_v28  ;;  %v3260_v17 = vld [vmem:[#allocation19_spill] sm:$0xff]  ;;  %v3263_v28 = vld [vmem:[#allocation22_spill] sm:$0xff] }
 0x2c4   :  { %v3264_v15 = vld [vmem:[#allocation23_spill] sm:$0xff] }
 0x2c8   :  { %v1521_v6 = vpop.eup %1520 }
 0x2c9   :  { %v752_v4 = vmul.f32 %v1521_v6, %v746_v1  ;;  %v3265_v6 = vld [vmem:[#allocation24_spill] sm:$0xff]  ;;  %v3266_v1 = vld [vmem:[#allocation25_spill] sm:$0xff] }
 0x2cb   :  { %1432 = vst [vmem:[%s2998_s4 + $0x18] sm:$0xff] %v752_v4  ;;  %786 = vmatmul.f32.vlgmr.msra.gmra.mxu0 %v752_v4  ;;  %806 = vmatmul.f32.vlgmr.msra.gmra.mxu1 %v752_v4 }
 0x2cc   :  { %826 = vmatmul.f32.vlgmr.msra.gmra.mxu2 %v752_v4  ;;  %846 = vmatmul.f32.vlgmr.msra.gmra.mxu3 %v752_v4  ;;  %v3267_v4 = vld [vmem:[#allocation26_spill] sm:$0xff] }
 0x2cd   :  { %1098 = vmatpush.msra.mxu0 %v2328_v61  ;;  %1118 = vmatpush.msra.mxu1 %v2334_v39 }
 0x2ce   :  { %1138 = vmatpush.msra.mxu2 %v2340_v40  ;;  %1158 = vmatpush.msra.mxu3 %v2346_v41 }
 0x2cf   :  { %1099 = vmatpush.msra.mxu0 %v2352_v42  ;;  %1119 = vmatpush.msra.mxu1 %v2358_v54 }
 0x2d0   :  { %1139 = vmatpush.msra.mxu2 %v2364_v48  ;;  %1159 = vmatpush.msra.mxu3 %v2370_v47 }
 0x2d1   :  { %1100 = vmatpush.msra.mxu0 %v2376_v3  ;;  %1120 = vmatpush.msra.mxu1 %v2382_v59 }
 0x2d2   :  { %1140 = vmatpush.msra.mxu2 %v2388_v50  ;;  %1160 = vmatpush.msra.mxu3 %v2394_v60 }
 0x2d3   :  { %1101 = vmatpush.msra.mxu0 %v2400_v46  ;;  %1121 = vmatpush.msra.mxu1 %v2406_v52 }
 0x2d4   :  { %1141 = vmatpush.msra.mxu2 %v2412_v58  ;;  %1161 = vmatpush.msra.mxu3 %v2418_v55 }
 0x2d5   :  { %1102 = vmatpush.msra.mxu0 %v2424_v62  ;;  %1122 = vmatpush.msra.mxu1 %v2430_v43 }
 0x2d6   :  { %1142 = vmatpush.msra.mxu2 %v2436_v45  ;;  %1162 = vmatpush.msra.mxu3 %v2442_v49 }
 0x2d7   :  { %1103 = vmatpush.msra.mxu0 %v2527_v63  ;;  %1123 = vmatpush.msra.mxu1 %v2533_v53 }
 0x2d8   :  { %1143 = vmatpush.msra.mxu2 %v2539_v44  ;;  %1163 = vmatpush.msra.mxu3 %v2545_v21 }
 0x2d9   :  { %1104 = vmatpush.msra.mxu0 %v2551_v22  ;;  %1124 = vmatpush.msra.mxu1 %v2557_v23 }
 0x2da   :  { %1144 = vmatpush.msra.mxu2 %v2563_v24  ;;  %1164 = vmatpush.msra.mxu3 %v2569_v25 }
 0x2db   :  { %1105 = vmatpush.msra.mxu0 %v2575_v26  ;;  %1125 = vmatpush.msra.mxu1 %v2581_v27 }
 0x2dc   :  { %1145 = vmatpush.msra.mxu2 %v2587_v29  ;;  %1165 = vmatpush.msra.mxu3 %v2593_v31 }
 0x2dd   :  { %1106 = vmatpush.msra.mxu0 %v2599_v33  ;;  %1126 = vmatpush.msra.mxu1 %v2605_v35 }
 0x2de   :  { %1146 = vmatpush.msra.mxu2 %v2611_v36  ;;  %1166 = vmatpush.msra.mxu3 %v2617_v37 }
 0x2df   :  { %1107 = vmatpush.msra.mxu0 %v2623_v38  ;;  %1127 = vmatpush.msra.mxu1 %v2629_v0 }
 0x2e0   :  { %1147 = vmatpush.msra.mxu2 %v3243_v32  ;;  %1167 = vmatpush.msra.mxu3 %v3244_v34 }
 0x2e1   :  { %1108 = vmatpush.msra.mxu0 %v3245_v13  ;;  %1128 = vmatpush.msra.mxu1 %v3246_v2 }
 0x2e2   :  { %1148 = vmatpush.msra.mxu2 %v3247_v7  ;;  %1168 = vmatpush.msra.mxu3 %v3248_v57 }
 0x2e3   :  { %1109 = vmatpush.msra.mxu0 %v3249_v14  ;;  %1129 = vmatpush.msra.mxu1 %v3250_v9 }
 0x2e4   :  { %1149 = vmatpush.msra.mxu2 %v3251_v8  ;;  %1169 = vmatpush.msra.mxu3 %v3252_v10 }
 0x2e5   :  { %1110 = vmatpush.msra.mxu0 %v3253_v30  ;;  %1130 = vmatpush.msra.mxu1 %v3254_v5 }
 0x2e6   :  { %1150 = vmatpush.msra.mxu2 %v3255_v12  ;;  %1170 = vmatpush.msra.mxu3 %v3256_v16 }
 0x2e7   :  { %1111 = vmatpush.msra.mxu0 %v3257_v20  ;;  %1131 = vmatpush.msra.mxu1 %v3258_v51  ;;  %v3268_v20 = vld [vmem:[#allocation27_spill] sm:$0xff] }
 0x2e8   :  { %1151 = vmatpush.msra.mxu2 %v3259_v11  ;;  %1171 = vmatpush.msra.mxu3 %v3260_v17  ;;  %v3269_v11 = vld [vmem:[#allocation28_spill] sm:$0xff]  ;;  %v3270_v17 = vld [vmem:[#allocation29_spill] sm:$0xff] }
 0x2e9   :  { %1112 = vmatpush.msra.mxu0 %v3261_v56  ;;  %1132 = vmatpush.msra.mxu1 %v3262_v19  ;;  %v3271_v56 = vld [vmem:[#allocation30_spill] sm:$0xff]  ;;  %v3272_v19 = vld [vmem:[#allocation31_spill] sm:$0xff] }
 0x2ea   :  { %1152 = vmatpush.msra.mxu2 %v3263_v28  ;;  %1172 = vmatpush.msra.mxu3 %v3264_v15 }
 0x2eb   :  { %1113 = vmatpush.msra.mxu0 %v3265_v6  ;;  %1133 = vmatpush.msra.mxu1 %v3266_v1  ;;  %v3273_v6 = vld [vmem:[#allocation32_spill] sm:$0xff] }
 0x2ec   :  { %1153 = vmatpush.msra.mxu2 %v3267_v4  ;;  %1173 = vmatpush.msra.mxu3 %v3268_v20  ;;  %v3274_v20 = vld [vmem:[#allocation33_spill] sm:$0xff] }
 0x2fc   :  { %v760_v51 = vpop.permute.xlu2 %759 }
 0x2fd   :  { %v762_v16 = vmul.f32 %v760_v51, %v3269_v11  ;;  %v763_v12 = vmul.f32 %v760_v51, %v3270_v17  ;;  %v765_v9 = vmul.f32 %v760_v51, %v3273_v6 }
 0x2ff   :  { %v766_v5 = vadd.f32 %v762_v16, %v3271_v56  ;;  %v767_v30 = vadd.f32 %v763_v12, %v3272_v19  ;;  %v769_v4 = vadd.f32 %v765_v9, %v3274_v20  ;;  %v3275_v19 = vld [vmem:[#allocation34_spill] sm:$0xff] }
 0x348   :  { %v787_v28 = vpop.f32.mrf.mxu0  ;;  %v807_v10 = vpop.f32.mrf.mxu1 }
 0x349   :  { %v850_v15 = vadd.f32 %v787_v28, %v766_v5  ;;  %v851_v8 = vadd.f32 %v807_v10, %v767_v30  ;;  %v764_v5 = vmul.f32 %v760_v51, %v3275_v19  ;;  %v3276_v28 = vld [vmem:[#allocation35_spill] sm:$0xff] }
 0x34b   :  { %v1434_v1 = vmul.f32 -1.442695, %v850_v15  ;;  %v1435_v14 = vmul.f32 -1.442695, %v851_v8  ;;  %v768_v8 = vadd.f32 %v764_v5, %v3276_v28 }
 0x34d   :  { %1522 = vpow2.f32 %v1434_v1 }
 0x34e   :  { %1524 = vpow2.f32 %v1435_v14 }
 0x34f   :  { %v847_v57 = vpop.f32.mrf.mxu3  ;;  %v827_v10 = vpop.f32.mrf.mxu2 }
 0x350   :  { %v853_v11 = vadd.f32 %v847_v57, %v769_v4  ;;  %v852_v1 = vadd.f32 %v827_v10, %v768_v8 }
 0x352   :  { %v1436_v7 = vmul.f32 -1.442695, %v853_v11 }
 0x353   :  { %v1523_v17 = vpop.eup %1522 }
 0x354   :  { %v1525_v2 = vpop.eup %1524  ;;  %v857_v16 = vadd.f32 1.0, %v1523_v17  ;;  %1526 = vpow2.f32 %v1436_v7 }
 0x355   :  { %v876_v12 = vadd.f32 1.0, %v1525_v2 }
 0x356   :  { %1528 = vrcp.f32 %v857_v16  ;;  %v869_v17 = vand.u32 2147483648, %v857_v16  ;;  %v867_v51 = vand.u32 2147483647, %v857_v16  ;;  %vm863_vm2 = vweird.f32 %v857_v16 }
 0x357   :  { %1530 = vrcp.f32 %v876_v12  ;;  %v888_v2 = vand.u32 2147483648, %v876_v12  ;;  %v886_v6 = vand.u32 2147483647, %v876_v12  ;;  %vm882_vm3 = vweird.f32 %v876_v12 }
 0x358   :  { %v870_v10 = vor.u32 1.1754944e-38, %v869_v17  ;;  %vm868_vm6 = vcmp.eq.f32.partialorder %v867_v51, 8.507059e+37 }
 0x359   :  { %vm887_vm7 = vcmp.eq.f32.partialorder %v886_v6, 8.507059e+37 }
 0x35a   :  { %v1527_v30 = vpop.eup %1526 }
 0x35b   :  { %v896_v15 = vadd.f32 1.0, %v1527_v30 }
 0x35c   :  { %v1529_v14 = vpop.eup %1528 }
 0x35d   :  { %v1531_v9 = vpop.eup %1530  ;;  %v859_v20 = vmul.f32 %v1529_v14, %v857_v16  ;;  %1532 = vrcp.f32 %v896_v15  ;;  %vm864_vm0 = vweird.f32 %v1529_v14  ;;  %vm902_vm9 = vweird.f32 %v896_v15 }
 0x35e   :  { %v878_v57 = vmul.f32 %v1531_v9, %v876_v12  ;;  %1534 = vtanh.f32 %v852_v1  ;;  %vm883_vm1 = vweird.f32 %v1531_v9  ;;  %vm865_vm4 = vmor %vm863_vm2, %vm864_vm0 }
 0x35f   :  { %v860_v11 = vsub.f32 1.0, %v859_v20  ;;  %vm884_vm5 = vmor %vm882_vm3, %vm883_vm1  ;;  %v889_v20 = vor.u32 1.1754944e-38, %v888_v2 }
 0x360   :  { %v879_v4 = vsub.f32 1.0, %v878_v57 }
 0x361   :  { %v861_v7 = vmul.f32 %v1529_v14, %v860_v11 }
 0x362   :  { %v880_v19 = vmul.f32 %v1531_v9, %v879_v4 }
 0x363   :  { %v1533_v56 = vpop.eup %1532  ;;  %v862_v5 = vadd.f32 %v1529_v14, %v861_v7 }
 0x364   :  { %v881_v30 = vadd.f32 %v1531_v9, %v880_v19  ;;  %v898_v8 = vmul.f32 %v1533_v56, %v896_v15  ;;  %v1535_v1 = vpop.eup %1534  ;;  %vm903_vm8 = vweird.f32 %v1533_v56  ;;  %v908_v19 = vand.u32 2147483648, %v896_v15 }
 0x365   :  { %v866_v57 = vsel %vm865_vm4, %v1529_v14, %v862_v5  ;;  %v906_v14 = vand.u32 2147483647, %v896_v15  ;;  %vm904_vm10 = vmor %vm902_vm9, %vm903_vm8 }
 0x366   :  { %v871_v28 = vsel %vm868_vm6, %v870_v10, %v866_v57  ;;  %v885_v11 = vsel %vm884_vm5, %v1531_v9, %v881_v30  ;;  %v899_v13 = vsub.f32 1.0, %v898_v8  ;;  %v909_v2 = vor.u32 1.1754944e-38, %v908_v19  ;;  %v3310_v19 = vld [vmem:[#allocation35_spill] sm:$0xff] }
 0x367   :  { %v890_v4 = vsel %vm887_vm7, %v889_v20, %v885_v11  ;;  %v913_v34 = vmul.f32 %v1535_v1, %v871_v28  ;;  %vm907_vm11 = vcmp.eq.f32.partialorder %v906_v14, 8.507059e+37  ;;  %v3308_v28 = vld [vmem:[#allocation33_spill] sm:$0xff]  ;;  %v3309_v11 = vld [vmem:[#allocation34_spill] sm:$0xff] }
 0x368   :  { %v912_v32 = vmul.f32 %v890_v4, %v2803_v18  ;;  %v900_v7 = vmul.f32 %v1533_v56, %v899_v13 }
 0x36a   :  { %v2882_v16 = vadd.f32 %v913_v34, %v912_v32  ;;  %v901_v12 = vadd.f32 %v1533_v56, %v900_v7  ;;  %v3307_v32 = vld [vmem:[#allocation32_spill] sm:$0xff] }
 0x36c   :  { %1536 = vtanh.f32 %v2882_v16  ;;  %v905_v17 = vsel %vm904_vm10, %v1533_v56, %v901_v12 }
 0x36d   :  { %v910_v9 = vsel %vm907_vm11, %v909_v2, %v905_v17 }
 0x372   :  { %v1537_v6 = vpop.eup %1536 }
 0x373   :  { %v916_v51 = vmul.f32 %v1537_v6, %v910_v9 }
 0x375   :  { %1437 = vst [vmem:[%s2998_s4 + $0x20] sm:$0xff] %v916_v51  ;;  %950 = vmatmul.f32.vlgmr.msrb.gmra.mxu0 %v916_v51  ;;  %970 = vmatmul.f32.vlgmr.msrb.gmra.mxu1 %v916_v51 }
 0x376   :  { %990 = vmatmul.f32.vlgmr.msrb.gmra.mxu2 %v916_v51  ;;  %1010 = vmatmul.f32.vlgmr.msrb.gmra.mxu3 %v916_v51 }
 0x377   :  { %1262 = vmatpush.msrb.mxu0 %v2328_v61  ;;  %1282 = vmatpush.msrb.mxu1 %v2334_v39  ;;  %v3277_v61 = vld [vmem:[#allocation2_spill] sm:$0xff]  ;;  %v3278_v39 = vld [vmem:[#allocation3_spill] sm:$0xff] }
 0x378   :  { %1302 = vmatpush.msrb.mxu2 %v2340_v40  ;;  %1322 = vmatpush.msrb.mxu3 %v2346_v41  ;;  %v3279_v40 = vld [vmem:[#allocation4_spill] sm:$0xff]  ;;  %v3280_v41 = vld [vmem:[#allocation5_spill] sm:$0xff] }
 0x379   :  { %1263 = vmatpush.msrb.mxu0 %v2352_v42  ;;  %1283 = vmatpush.msrb.mxu1 %v2358_v54  ;;  %v3281_v42 = vld [vmem:[#allocation6_spill] sm:$0xff]  ;;  %v3282_v54 = vld [vmem:[#allocation7_spill] sm:$0xff] }
 0x37a   :  { %1303 = vmatpush.msrb.mxu2 %v2364_v48  ;;  %1323 = vmatpush.msrb.mxu3 %v2370_v47  ;;  %v3283_v48 = vld [vmem:[#allocation8_spill] sm:$0xff]  ;;  %v3284_v47 = vld [vmem:[#allocation9_spill] sm:$0xff] }
 0x37b   :  { %1264 = vmatpush.msrb.mxu0 %v2376_v3  ;;  %1284 = vmatpush.msrb.mxu1 %v2382_v59  ;;  %v3285_v3 = vld [vmem:[#allocation10_spill] sm:$0xff]  ;;  %v3286_v59 = vld [vmem:[#allocation11_spill] sm:$0xff] }
 0x37c   :  { %1304 = vmatpush.msrb.mxu2 %v2388_v50  ;;  %1324 = vmatpush.msrb.mxu3 %v2394_v60  ;;  %v3287_v50 = vld [vmem:[#allocation12_spill] sm:$0xff]  ;;  %v3288_v60 = vld [vmem:[#allocation13_spill] sm:$0xff] }
 0x37d   :  { %1265 = vmatpush.msrb.mxu0 %v2400_v46  ;;  %1285 = vmatpush.msrb.mxu1 %v2406_v52  ;;  %v3289_v46 = vld [vmem:[#allocation14_spill] sm:$0xff]  ;;  %v3290_v52 = vld [vmem:[#allocation15_spill] sm:$0xff] }
 0x37e   :  { %1305 = vmatpush.msrb.mxu2 %v2412_v58  ;;  %1325 = vmatpush.msrb.mxu3 %v2418_v55  ;;  %v3291_v58 = vld [vmem:[#allocation16_spill] sm:$0xff]  ;;  %v3292_v55 = vld [vmem:[#allocation17_spill] sm:$0xff] }
 0x37f   :  { %1266 = vmatpush.msrb.mxu0 %v2424_v62  ;;  %1286 = vmatpush.msrb.mxu1 %v2430_v43  ;;  %v3293_v62 = vld [vmem:[#allocation18_spill] sm:$0xff]  ;;  %v3294_v43 = vld [vmem:[#allocation19_spill] sm:$0xff] }
 0x380   :  { %1306 = vmatpush.msrb.mxu2 %v2436_v45  ;;  %1326 = vmatpush.msrb.mxu3 %v2442_v49  ;;  %v3295_v45 = vld [vmem:[#allocation20_spill] sm:$0xff]  ;;  %v3296_v49 = vld [vmem:[#allocation21_spill] sm:$0xff] }
 0x381   :  { %1267 = vmatpush.msrb.mxu0 %v2527_v63  ;;  %1287 = vmatpush.msrb.mxu1 %v2533_v53  ;;  %v3297_v63 = vld [vmem:[#allocation22_spill] sm:$0xff]  ;;  %v3298_v53 = vld [vmem:[#allocation23_spill] sm:$0xff] }
 0x382   :  { %1307 = vmatpush.msrb.mxu2 %v2539_v44  ;;  %1327 = vmatpush.msrb.mxu3 %v2545_v21  ;;  %v3299_v44 = vld [vmem:[#allocation24_spill] sm:$0xff]  ;;  %v3300_v21 = vld [vmem:[#allocation25_spill] sm:$0xff] }
 0x383   :  { %1268 = vmatpush.msrb.mxu0 %v2551_v22  ;;  %1288 = vmatpush.msrb.mxu1 %v2557_v23  ;;  %v3301_v22 = vld [vmem:[#allocation26_spill] sm:$0xff]  ;;  %v3302_v23 = vld [vmem:[#allocation27_spill] sm:$0xff] }
 0x384   :  { %1308 = vmatpush.msrb.mxu2 %v2563_v24  ;;  %1328 = vmatpush.msrb.mxu3 %v2569_v25  ;;  %v924_v24 = vpop.permute.xlu2 %923  ;;  %v3303_v25 = vld [vmem:[#allocation28_spill] sm:$0xff] }
 0x385   :  { %1269 = vmatpush.msrb.mxu0 %v2575_v26  ;;  %1289 = vmatpush.msrb.mxu1 %v2581_v27  ;;  %v926_v26 = vmul.f32 %v924_v24, %v3303_v25  ;;  %v3304_v27 = vld [vmem:[#allocation29_spill] sm:$0xff]  ;;  %v929_v34 = vmul.f32 %v924_v24, %v3307_v32  ;;  %v928_v4 = vmul.f32 %v924_v24, %v3309_v11 }
 0x386   :  { %1309 = vmatpush.msrb.mxu2 %v2587_v29  ;;  %1329 = vmatpush.msrb.mxu3 %v2593_v31  ;;  %v927_v29 = vmul.f32 %v924_v24, %v3304_v27  ;;  %v3305_v31 = vld [vmem:[#allocation30_spill] sm:$0xff] }
 0x387   :  { %1270 = vmatpush.msrb.mxu0 %v2599_v33  ;;  %1290 = vmatpush.msrb.mxu1 %v2605_v35  ;;  %v930_v33 = vadd.f32 %v926_v26, %v3305_v31  ;;  %v3306_v35 = vld [vmem:[#allocation31_spill] sm:$0xff]  ;;  %v933_v15 = vadd.f32 %v929_v34, %v3308_v28  ;;  %v932_v14 = vadd.f32 %v928_v4, %v3310_v19 }
 0x388   :  { %1310 = vmatpush.msrb.mxu2 %v2611_v36  ;;  %1330 = vmatpush.msrb.mxu3 %v2617_v37  ;;  %v931_v36 = vadd.f32 %v927_v29, %v3306_v35 }
 0x389   :  { %1271 = vmatpush.msrb.mxu0 %v2623_v38  ;;  %1291 = vmatpush.msrb.mxu1 %v2629_v0 }
 0x38a   :  { %1311 = vmatpush.msrb.mxu2 %v3277_v61  ;;  %1331 = vmatpush.msrb.mxu3 %v3278_v39 }
 0x38b   :  { %1272 = vmatpush.msrb.mxu0 %v3279_v40  ;;  %1292 = vmatpush.msrb.mxu1 %v3280_v41 }
 0x38c   :  { %1312 = vmatpush.msrb.mxu2 %v3281_v42  ;;  %1332 = vmatpush.msrb.mxu3 %v3282_v54 }
 0x38d   :  { %1273 = vmatpush.msrb.mxu0 %v3283_v48  ;;  %1293 = vmatpush.msrb.mxu1 %v3284_v47 }
 0x38e   :  { %1313 = vmatpush.msrb.mxu2 %v3285_v3  ;;  %1333 = vmatpush.msrb.mxu3 %v3286_v59 }
 0x38f   :  { %1274 = vmatpush.msrb.mxu0 %v3287_v50  ;;  %1294 = vmatpush.msrb.mxu1 %v3288_v60 }
 0x390   :  { %1314 = vmatpush.msrb.mxu2 %v3289_v46  ;;  %1334 = vmatpush.msrb.mxu3 %v3290_v52 }
 0x391   :  { %1275 = vmatpush.msrb.mxu0 %v3291_v58  ;;  %1295 = vmatpush.msrb.mxu1 %v3292_v55 }
 0x392   :  { %1315 = vmatpush.msrb.mxu2 %v3293_v62  ;;  %1335 = vmatpush.msrb.mxu3 %v3294_v43 }
 0x393   :  { %1276 = vmatpush.msrb.mxu0 %v3295_v45  ;;  %1296 = vmatpush.msrb.mxu1 %v3296_v49 }
 0x394   :  { %1316 = vmatpush.msrb.mxu2 %v3297_v63  ;;  %1336 = vmatpush.msrb.mxu3 %v3298_v53 }
 0x395   :  { %1277 = vmatpush.msrb.mxu0 %v3299_v44  ;;  %1297 = vmatpush.msrb.mxu1 %v3300_v21 }
 0x396   :  { %1317 = vmatpush.msrb.mxu2 %v3301_v22  ;;  %1337 = vmatpush.msrb.mxu3 %v3302_v23 }
 0x3f2   :  { %v951_v37 = vpop.f32.mrf.mxu0  ;;  %v971_v38 = vpop.f32.mrf.mxu1 }
 0x3f3   :  { %v1014_v0 = vadd.f32 %v951_v37, %v930_v33  ;;  %v1015_v18 = vadd.f32 %v971_v38, %v931_v36 }
 0x3f5   :  { %v1439_v13 = vmul.f32 -1.442695, %v1014_v0  ;;  %v1440_v56 = vmul.f32 -1.442695, %v1015_v18 }
 0x3f7   :  { %1538 = vpow2.f32 %v1439_v13 }
 0x3f8   :  { %1540 = vpow2.f32 %v1440_v56 }
 0x3f9   :  { %v1011_v5 = vpop.f32.mrf.mxu3  ;;  %v991_v7 = vpop.f32.mrf.mxu2 }
 0x3fa   :  { %v1017_v10 = vadd.f32 %v1011_v5, %v933_v15  ;;  %v1016_v6 = vadd.f32 %v991_v7, %v932_v14 }
 0x3fc   :  { %v1441_v30 = vmul.f32 -1.442695, %v1017_v10 }
 0x3fd   :  { %v1539_v8 = vpop.eup %1538 }
 0x3fe   :  { %v1541_v20 = vpop.eup %1540  ;;  %v1021_v57 = vadd.f32 1.0, %v1539_v8  ;;  %1542 = vpow2.f32 %v1441_v30 }
 0x3ff   :  { %v1040_v1 = vadd.f32 1.0, %v1541_v20 }
 0x400   :  { %1544 = vrcp.f32 %v1021_v57  ;;  %v1033_v41 = vand.u32 2147483648, %v1021_v57  ;;  %v1031_v48 = vand.u32 2147483647, %v1021_v57  ;;  %vm1027_vm14 = vweird.f32 %v1021_v57 }
 0x401   :  { %1546 = vrcp.f32 %v1040_v1  ;;  %v1052_v42 = vand.u32 2147483648, %v1040_v1  ;;  %v1050_v3 = vand.u32 2147483647, %v1040_v1  ;;  %vm1046_vm15 = vweird.f32 %v1040_v1 }
 0x402   :  { %v1034_v60 = vor.u32 1.1754944e-38, %v1033_v41  ;;  %vm1032_vm2 = vcmp.eq.f32.partialorder %v1031_v48, 8.507059e+37 }
 0x403   :  { %v1053_v58 = vor.u32 1.1754944e-38, %v1052_v42  ;;  %vm1051_vm3 = vcmp.eq.f32.partialorder %v1050_v3, 8.507059e+37 }
 0x404   :  { %v1543_v12 = vpop.eup %1542 }
 0x405   :  { %v1060_v17 = vadd.f32 1.0, %v1543_v12 }
 0x406   :  { %v1545_v2 = vpop.eup %1544 }
 0x407   :  { %v1547_v9 = vpop.eup %1546  ;;  %v1023_v51 = vmul.f32 %v1545_v2, %v1021_v57  ;;  %1548 = vrcp.f32 %v1060_v17  ;;  %vm1028_vm12 = vweird.f32 %v1545_v2  ;;  %v1072_v24 = vand.u32 2147483648, %v1060_v17 }
 0x408   :  { %v1042_v61 = vmul.f32 %v1547_v9, %v1040_v1  ;;  %1550 = vtanh.f32 %v1016_v6  ;;  %vm1047_vm13 = vweird.f32 %v1547_v9  ;;  %vm1029_vm0 = vmor %vm1027_vm14, %vm1028_vm12  ;;  %vm1066_vm5 = vweird.f32 %v1060_v17 }
 0x409   :  { %v1024_v39 = vsub.f32 1.0, %v1023_v51  ;;  %vm1048_vm1 = vmor %vm1046_vm15, %vm1047_vm13  ;;  %v1070_v26 = vand.u32 2147483647, %v1060_v17  ;;  %v1073_v33 = vor.u32 1.1754944e-38, %v1072_v24 }
 0x40a   :  { %v1043_v40 = vsub.f32 1.0, %v1042_v61 }
 0x40b   :  { %v1025_v54 = vmul.f32 %v1545_v2, %v1024_v39  ;;  %vm1071_vm7 = vcmp.eq.f32.partialorder %v1070_v26, 8.507059e+37 }
 0x40c   :  { %v1044_v47 = vmul.f32 %v1547_v9, %v1043_v40 }
 0x40d   :  { %v1549_v59 = vpop.eup %1548  ;;  %v1026_v50 = vadd.f32 %v1545_v2, %v1025_v54 }
 0x40e   :  { %v1045_v46 = vadd.f32 %v1547_v9, %v1044_v47  ;;  %v1062_v52 = vmul.f32 %v1549_v59, %v1060_v17  ;;  %v1551_v62 = vpop.eup %1550  ;;  %vm1067_vm4 = vweird.f32 %v1549_v59 }
 0x40f   :  { %v1030_v55 = vsel %vm1029_vm0, %v1545_v2, %v1026_v50  ;;  %vm1068_vm6 = vmor %vm1066_vm5, %vm1067_vm4 }
 0x410   :  { %v1035_v43 = vsel %vm1032_vm2, %v1034_v60, %v1030_v55  ;;  %v1049_v45 = vsel %vm1048_vm1, %v1547_v9, %v1045_v46  ;;  %v1063_v49 = vsub.f32 1.0, %v1062_v52 }
 0x411   :  { %v1054_v63 = vsel %vm1051_vm3, %v1053_v58, %v1049_v45  ;;  %v1077_v53 = vmul.f32 %v1551_v62, %v1035_v43 }
 0x412   :  { %v1076_v44 = vmul.f32 %v1054_v63, %v2882_v16  ;;  %v1064_v21 = vmul.f32 %v1549_v59, %v1063_v49  ;;  %v1088_v16 = vpop.permute.xlu0 %1087 }
 0x413   :  { %v1090_v0 = vmul.f32 %v1088_v16, %v3303_v25  ;;  %v1091_v18 = vmul.f32 %v1088_v16, %v3304_v27  ;;  %v1093_v30 = vmul.f32 %v1088_v16, %v3307_v32  ;;  %v1092_v6 = vmul.f32 %v1088_v16, %v3309_v11 }
 0x414   :  { %v2961_v22 = vadd.f32 %v1077_v53, %v1076_v44  ;;  %v1065_v23 = vadd.f32 %v1549_v59, %v1064_v21 }
 0x415   :  { %v1094_v34 = vadd.f32 %v1090_v0, %v3305_v31  ;;  %v1095_v13 = vadd.f32 %v1091_v18, %v3306_v35  ;;  %v1097_v57 = vadd.f32 %v1093_v30, %v3308_v28  ;;  %v1096_v61 = vadd.f32 %v1092_v6, %v3310_v19 }
 0x416   :  { %1552 = vtanh.f32 %v2961_v22  ;;  %v1069_v29 = vsel %vm1068_vm6, %v1549_v59, %v1065_v23 }
 0x417   :  { %v1074_v37 = vsel %vm1071_vm7, %v1073_v33, %v1069_v29 }
 0x41c   :  { %v1553_v36 = vpop.eup %1552 }
 0x41d   :  { %v1080_v38 = vmul.f32 %v1553_v36, %v1074_v37 }
 0x41f   :  { %1442 = vst [vmem:[%s2998_s4 + $0x28] sm:$0xff] %v1080_v38  ;;  %1114 = vmatmul.f32.vlgmr.msra.gmra.mxu0 %v1080_v38  ;;  %1134 = vmatmul.f32.vlgmr.msra.gmra.mxu1 %v1080_v38 }
 0x420   :  { %1154 = vmatmul.f32.vlgmr.msra.gmra.mxu2 %v1080_v38  ;;  %1174 = vmatmul.f32.vlgmr.msra.gmra.mxu3 %v1080_v38 }
 0x49c   :  { %v1115_v56 = vpop.f32.mrf.mxu0  ;;  %v1135_v15 = vpop.f32.mrf.mxu1 }
 0x49d   :  { %v1178_v5 = vadd.f32 %v1115_v56, %v1094_v34  ;;  %v1179_v10 = vadd.f32 %v1135_v15, %v1095_v13 }
 0x49f   :  { %v1444_v8 = vmul.f32 -1.442695, %v1178_v5  ;;  %v1445_v20 = vmul.f32 -1.442695, %v1179_v10 }
 0x4a1   :  { %1554 = vpow2.f32 %v1444_v8 }
 0x4a2   :  { %1556 = vpow2.f32 %v1445_v20 }
 0x4a3   :  { %v1175_v1 = vpop.f32.mrf.mxu3  ;;  %v1155_v9 = vpop.f32.mrf.mxu2 }
 0x4a4   :  { %v1181_v4 = vadd.f32 %v1175_v1, %v1097_v57  ;;  %v1180_v41 = vadd.f32 %v1155_v9, %v1096_v61 }
 0x4a6   :  { %v1446_v7 = vmul.f32 -1.442695, %v1181_v4 }
 0x4a7   :  { %v1555_v12 = vpop.eup %1554 }
 0x4a8   :  { %v1557_v14 = vpop.eup %1556  ;;  %v1185_v17 = vadd.f32 1.0, %v1555_v12  ;;  %1558 = vpow2.f32 %v1446_v7 }
 0x4a9   :  { %v1204_v2 = vadd.f32 1.0, %v1557_v14 }
 0x4aa   :  { %1560 = vrcp.f32 %v1185_v17  ;;  %v1197_v59 = vand.u32 2147483648, %v1185_v17  ;;  %v1195_v46 = vand.u32 2147483647, %v1185_v17  ;;  %vm1191_vm10 = vweird.f32 %v1185_v17 }
 0x4ab   :  { %1562 = vrcp.f32 %v1204_v2  ;;  %v1216_v50 = vand.u32 2147483648, %v1204_v2  ;;  %v1214_v58 = vand.u32 2147483647, %v1204_v2  ;;  %vm1210_vm11 = vweird.f32 %v1204_v2 }
 0x4ac   :  { %v1198_v43 = vor.u32 1.1754944e-38, %v1197_v59  ;;  %vm1196_vm14 = vcmp.eq.f32.partialorder %v1195_v46, 8.507059e+37 }
 0x4ad   :  { %v1217_v63 = vor.u32 1.1754944e-38, %v1216_v50  ;;  %vm1215_vm15 = vcmp.eq.f32.partialorder %v1214_v58, 8.507059e+37 }
 0x4ae   :  { %v1559_v51 = vpop.eup %1558 }
 0x4af   :  { %v1224_v39 = vadd.f32 1.0, %v1559_v51 }
 0x4b0   :  { %v1561_v40 = vpop.eup %1560 }
 0x4b1   :  { %v1563_v42 = vpop.eup %1562  ;;  %v1187_v54 = vmul.f32 %v1561_v40, %v1185_v17  ;;  %1564 = vrcp.f32 %v1224_v39  ;;  %vm1192_vm8 = vweird.f32 %v1561_v40  ;;  %v1236_v16 = vand.u32 2147483648, %v1224_v39 }
 0x4b2   :  { %v1206_v48 = vmul.f32 %v1563_v42, %v1204_v2  ;;  %1566 = vtanh.f32 %v1180_v41  ;;  %vm1211_vm9 = vweird.f32 %v1563_v42  ;;  %vm1193_vm12 = vmor %vm1191_vm10, %vm1192_vm8  ;;  %vm1230_vm1 = vweird.f32 %v1224_v39 }
 0x4b3   :  { %v1188_v47 = vsub.f32 1.0, %v1187_v54  ;;  %vm1212_vm13 = vmor %vm1210_vm11, %vm1211_vm9  ;;  %v1234_v0 = vand.u32 2147483647, %v1224_v39  ;;  %v1237_v34 = vor.u32 1.1754944e-38, %v1236_v16 }
 0x4b4   :  { %v1207_v3 = vsub.f32 1.0, %v1206_v48 }
 0x4b5   :  { %v1189_v60 = vmul.f32 %v1561_v40, %v1188_v47  ;;  %vm1235_vm3 = vcmp.eq.f32.partialorder %v1234_v0, 8.507059e+37 }
 0x4b6   :  { %v1208_v52 = vmul.f32 %v1563_v42, %v1207_v3 }
 0x4b7   :  { %v1565_v55 = vpop.eup %1564  ;;  %v1190_v62 = vadd.f32 %v1561_v40, %v1189_v60 }
 0x4b8   :  { %v1209_v45 = vadd.f32 %v1563_v42, %v1208_v52  ;;  %v1226_v49 = vmul.f32 %v1565_v55, %v1224_v39  ;;  %v1567_v44 = vpop.eup %1566  ;;  %vm1231_vm0 = vweird.f32 %v1565_v55 }
 0x4b9   :  { %v1194_v53 = vsel %vm1193_vm12, %v1561_v40, %v1190_v62  ;;  %vm1232_vm2 = vmor %vm1230_vm1, %vm1231_vm0 }
 0x4ba   :  { %v1199_v21 = vsel %vm1196_vm14, %v1198_v43, %v1194_v53  ;;  %v1213_v23 = vsel %vm1212_vm13, %v1563_v42, %v1209_v45  ;;  %v1227_v24 = vsub.f32 1.0, %v1226_v49 }
 0x4bb   :  { %v1218_v26 = vsel %vm1215_vm15, %v1217_v63, %v1213_v23  ;;  %v1241_v29 = vmul.f32 %v1567_v44, %v1199_v21 }
 0x4bc   :  { %v1240_v33 = vmul.f32 %v1218_v26, %v2961_v22  ;;  %v1228_v36 = vmul.f32 %v1565_v55, %v1227_v24  ;;  %v1252_v22 = vpop.permute.xlu1 %1251 }
 0x4bd   :  { %v1254_v5 = vmul.f32 %v1252_v22, %v3303_v25  ;;  %v1255_v10 = vmul.f32 %v1252_v22, %v3304_v27  ;;  %v1257_v7 = vmul.f32 %v1252_v22, %v3307_v32  ;;  %v1256_v51 = vmul.f32 %v1252_v22, %v3309_v11 }
 0x4be   :  { %v2976_v37 = vadd.f32 %v1241_v29, %v1240_v33  ;;  %v1229_v38 = vadd.f32 %v1565_v55, %v1228_v36 }
 0x4bf   :  { %v1258_v30 = vadd.f32 %v1254_v5, %v3305_v31  ;;  %v1259_v8 = vadd.f32 %v1255_v10, %v3306_v35  ;;  %v1261_v17 = vadd.f32 %v1257_v7, %v3308_v28  ;;  %v1260_v39 = vadd.f32 %v1256_v51, %v3310_v19 }
 0x4c0   :  { %1568 = vtanh.f32 %v2976_v37  ;;  %v1233_v18 = vsel %vm1232_vm2, %v1565_v55, %v1229_v38 }
 0x4c1   :  { %v1238_v56 = vsel %vm1235_vm3, %v1237_v34, %v1233_v18 }
 0x4c6   :  { %v1569_v13 = vpop.eup %1568 }
 0x4c7   :  { %v1244_v15 = vmul.f32 %v1569_v13, %v1238_v56 }
 0x4c9   :  { %1447 = vst [vmem:[%s2998_s4 + $0x30] sm:$0xff] %v1244_v15  ;;  %1278 = vmatmul.f32.vlgmr.msrb.gmra.mxu0 %v1244_v15  ;;  %1298 = vmatmul.f32.vlgmr.msrb.gmra.mxu1 %v1244_v15 }
 0x4ca   :  { %1318 = vmatmul.f32.vlgmr.msrb.gmra.mxu2 %v1244_v15  ;;  %1338 = vmatmul.f32.vlgmr.msrb.gmra.mxu3 %v1244_v15 }
 0x546   :  { %v1279_v20 = vpop.f32.mrf.mxu0  ;;  %v1299_v57 = vpop.f32.mrf.mxu1 }
 0x547   :  { %v1342_v1 = vadd.f32 %v1279_v20, %v1258_v30  ;;  %v1343_v4 = vadd.f32 %v1299_v57, %v1259_v8 }
 0x549   :  { %v1449_v12 = vmul.f32 -1.442695, %v1342_v1  ;;  %v1450_v14 = vmul.f32 -1.442695, %v1343_v4 }
 0x54b   :  { %1570 = vpow2.f32 %v1449_v12 }
 0x54c   :  { %1572 = vpow2.f32 %v1450_v14 }
 0x54d   :  { %v1339_v2 = vpop.f32.mrf.mxu3  ;;  %v1319_v61 = vpop.f32.mrf.mxu2 }
 0x54e   :  { %v1345_v25 = vadd.f32 %v1339_v2, %v1261_v17  ;;  %v1344_v42 = vadd.f32 %v1319_v61, %v1260_v39 }
 0x550   :  { %v1451_v6 = vmul.f32 -1.442695, %v1345_v25 }
 0x551   :  { %v1571_v27 = vpop.eup %1570 }
 0x552   :  { %v1573_v9 = vpop.eup %1572  ;;  %v1349_v31 = vadd.f32 1.0, %v1571_v27  ;;  %1574 = vpow2.f32 %v1451_v6 }
 0x553   :  { %v1368_v35 = vadd.f32 1.0, %v1573_v9 }
 0x554   :  { %1576 = vrcp.f32 %v1349_v31  ;;  %v1361_v59 = vand.u32 2147483648, %v1349_v31  ;;  %v1359_v11 = vand.u32 2147483647, %v1349_v31  ;;  %vm1355_vm6 = vweird.f32 %v1349_v31 }
 0x555   :  { %1578 = vrcp.f32 %v1368_v35  ;;  %v1380_v50 = vand.u32 2147483648, %v1368_v35  ;;  %v1378_v52 = vand.u32 2147483647, %v1368_v35  ;;  %vm1374_vm7 = vweird.f32 %v1368_v35 }
 0x556   :  { %v1362_v55 = vor.u32 1.1754944e-38, %v1361_v59  ;;  %vm1360_vm10 = vcmp.eq.f32.partialorder %v1359_v11, 8.507059e+37 }
 0x557   :  { %v1381_v45 = vor.u32 1.1754944e-38, %v1380_v50  ;;  %vm1379_vm11 = vcmp.eq.f32.partialorder %v1378_v52, 8.507059e+37 }
 0x558   :  { %v1575_v32 = vpop.eup %1574 }
 0x559   :  { %v1388_v40 = vadd.f32 1.0, %v1575_v32 }
 0x55a   :  { %v1577_v41 = vpop.eup %1576 }
 0x55b   :  { %v1579_v28 = vpop.eup %1578  ;;  %v1351_v54 = vmul.f32 %v1577_v41, %v1349_v31  ;;  %1580 = vrcp.f32 %v1388_v40  ;;  %vm1356_vm4 = vweird.f32 %v1577_v41  ;;  %v1400_v38 = vand.u32 2147483648, %v1388_v40 }
 0x55c   :  { %v1370_v48 = vmul.f32 %v1579_v28, %v1368_v35  ;;  %1582 = vtanh.f32 %v1344_v42  ;;  %vm1375_vm5 = vweird.f32 %v1579_v28  ;;  %vm1357_vm8 = vmor %vm1355_vm6, %vm1356_vm4  ;;  %vm1394_vm13 = vweird.f32 %v1388_v40 }
 0x55d   :  { %v1352_v47 = vsub.f32 1.0, %v1351_v54  ;;  %vm1376_vm9 = vmor %vm1374_vm7, %vm1375_vm5  ;;  %v1398_v16 = vand.u32 2147483647, %v1388_v40  ;;  %v1401_v18 = vor.u32 1.1754944e-38, %v1400_v38 }
 0x55e   :  { %v1371_v3 = vsub.f32 1.0, %v1370_v48 }
 0x55f   :  { %v1353_v60 = vmul.f32 %v1577_v41, %v1352_v47  ;;  %vm1399_vm15 = vcmp.eq.f32.partialorder %v1398_v16, 8.507059e+37 }
 0x560   :  { %v1372_v46 = vmul.f32 %v1579_v28, %v1371_v3 }
 0x561   :  { %v1581_v58 = vpop.eup %1580  ;;  %v1354_v19 = vadd.f32 %v1577_v41, %v1353_v60 }
 0x562   :  { %v1373_v62 = vadd.f32 %v1579_v28, %v1372_v46  ;;  %v1390_v43 = vmul.f32 %v1581_v58, %v1388_v40  ;;  %v1583_v63 = vpop.eup %1582  ;;  %vm1395_vm12 = vweird.f32 %v1581_v58 }
 0x563   :  { %v1358_v49 = vsel %vm1357_vm8, %v1577_v41, %v1354_v19  ;;  %vm1396_vm14 = vmor %vm1394_vm13, %vm1395_vm12 }
 0x564   :  { %v1363_v53 = vsel %vm1360_vm10, %v1362_v55, %v1358_v49  ;;  %v1377_v44 = vsel %vm1376_vm9, %v1579_v28, %v1373_v62  ;;  %v1391_v21 = vsub.f32 1.0, %v1390_v43 }
 0x565   :  { %v1382_v23 = vsel %vm1379_vm11, %v1381_v45, %v1377_v44  ;;  %v1405_v24 = vmul.f32 %v1583_v63, %v1363_v53 }
 0x566   :  { %v1404_v26 = vmul.f32 %v1382_v23, %v2976_v37  ;;  %v1392_v29 = vmul.f32 %v1581_v58, %v1391_v21 }
 0x568   :  { %v1406_v33 = vadd.f32 %v1405_v24, %v1404_v26  ;;  %v1393_v36 = vadd.f32 %v1581_v58, %v1392_v29 }
 0x56a   :  { %1584 = vtanh.f32 %v1406_v33  ;;  %v1397_v0 = vsel %vm1396_vm14, %v1581_v58, %v1393_v36 }
 0x56b   :  { %v1402_v13 = vsel %vm1399_vm15, %v1401_v18, %v1397_v0 }
 0x570   :  { %v1585_v34 = vpop.eup %1584 }
 0x571   :  { %v1408_v56 = vmul.f32 %v1585_v34, %v1402_v13 }
 0x573   :  { %1452 = vst [vmem:[%s2998_s4 + $0x38] sm:$0xff] %v1408_v56 }

</bundles_post_ra>
